<compile_context>
chip_gen: v6e
topology: v6e:2x2x1
jax: 0.10.0
libtpu: 0.0.40
codegen_flags: <defaults>
</compile_context>

<pallas_src>
import functools

import jax
import jax.numpy as jnp
from jax.experimental import pallas as pl
from jax.experimental.pallas import tpu as pltpu


KERNEL_SET = (2, 3, 6, 7)


def _dilated_inception_kernel(x_ref, w_ref, b_ref, o_ref, *,
                              dilation, kernel_set, cout_per):
    # x_ref: (1, C_in, seq_len, TILE_N)   nodes on the lane axis
    # w_ref: (n_taps*C_out*C_in,) f32     flat, in SMEM
    # b_ref: (C_out,) f32                 in SMEM
    # o_ref: (1, C_out, t_out, TILE_N)
    _, c_out, t_out, tile_n = o_ref.shape
    c_in = x_ref.shape[1]
    n_taps = max(kernel_set)

    # Bias-initialised accumulators, one (t_out, tile_n) slab per out channel.
    # Total ~= c_out*t_out*tile_n f32 — a few vregs, stays resident.
    acc = [jnp.full((t_out, tile_n), b_ref[co], dtype=jnp.float32)
           for co in range(c_out)]

    # Fully unrolled scalar(SMEM) x vector(VPU) MACs. Each tap window is a
    # static ref-level slice along the sublane (time) axis; taps that are
    # structurally zero for the shorter branches are skipped at trace time.
    for s in range(n_taps):
        start = dilation * s
        for ci in range(c_in):
            xs = x_ref[0, ci, pl.ds(start, t_out), :].astype(jnp.float32)
            for j, k in enumerate(kernel_set):
                if k < n_taps - s:
                    continue  # zero-padded tap for this branch
                for cc in range(cout_per):
                    co = j * cout_per + cc
                    w_idx = (s * c_out + co) * c_in + ci
                    acc[co] = acc[co] + w_ref[w_idx] * xs

    for co in range(c_out):
        o_ref[0, co, :, :] = acc[co].astype(o_ref.dtype)


def dilated_inception_pallas(x, weights, biases, *, dilation_factor=2, tile_n=None):
    """Forward pass of dilated_inception.

    x       : (B, C_in, num_nodes, seq_len) float32, NCHW (module-native)
    weights : list of 4 arrays, weights[j] has shape (cout_per, C_in, 1, k_j)
    biases  : list of 4 arrays, biases[j] has shape (cout_per,)
    returns : (B, C_out, num_nodes, seq_len - dilation*(max_k - 1))
    """
    B, c_in, n_nodes, seq_len = x.shape
    kernel_set = KERNEL_SET
    cout_per = weights[0].shape[0]
    c_out = cout_per * len(kernel_set)
    n_taps = max(kernel_set)
    t_out = seq_len - dilation_factor * (n_taps - 1)
    assert t_out >= 1, "sequence too short for the largest dilated kernel"

    # Fold the four branch convs (+ crop + concat) into one zero-padded tap
    # bank W[s, co, ci]: branch j (kernel k) tap r lands at s = n_taps - k + r.
    # (Cheap: a few pads/concats; constant-folded under jit for fixed params.)
    w_parts = []
    for j, k in enumerate(kernel_set):
        wj = weights[j].reshape(cout_per, c_in, k).astype(jnp.float32)
        w_parts.append(jnp.pad(wj, ((0, 0), (0, 0), (n_taps - k, 0))))
    w_all = jnp.concatenate(w_parts, axis=0)               # (c_out, c_in, n_taps)
    w_flat = jnp.transpose(w_all, (2, 0, 1)).reshape(-1)   # (n_taps*c_out*c_in,)
    b_flat = jnp.concatenate([b.astype(jnp.float32) for b in biases])  # (c_out,)

    # Node-on-lanes working layout (wrapper transpose = layout plumbing).
    x_t = jnp.transpose(x, (0, 1, 3, 2))                   # (B, c_in, seq_len, n_nodes)

    if tile_n is None:
        # Full node axis per step when it fits comfortably; otherwise a
        # 128-multiple tile (lane-dense, small vs. VMEM on v5e/v6e/v7x).
        tile_n = n_nodes if n_nodes <= 1024 else 512
        # v7x has 2 TensorCores: keep >=2 'parallel' grid iterations when B==1.
        if B == 1 and tile_n == n_nodes and n_nodes % 256 == 0:
            tile_n = n_nodes // 2
    tile_n = min(tile_n, n_nodes)
    grid = (B, pl.cdiv(n_nodes, tile_n))

    kernel = functools.partial(
        _dilated_inception_kernel,
        dilation=dilation_factor, kernel_set=kernel_set, cout_per=cout_per)

    itemsize = jnp.dtype(x.dtype).itemsize
    flops = 2 * B * n_nodes * t_out * c_in * cout_per * sum(kernel_set)
    bytes_accessed = (x.size + B * c_out * n_nodes * t_out) * itemsize \
        + (w_flat.size + b_flat.size) * 4

    out_t = pl.pallas_call(
        kernel,
        out_shape=jax.ShapeDtypeStruct((B, c_out, t_out, n_nodes), x.dtype),
        grid_spec=pltpu.PrefetchScalarGridSpec(
            num_scalar_prefetch=0,
            grid=grid,
            in_specs=[
                pl.BlockSpec((1, c_in, seq_len, tile_n), lambda b, j: (b, 0, 0, j)),
                pl.BlockSpec(memory_space=pltpu.MemorySpace.SMEM),
                pl.BlockSpec(memory_space=pltpu.MemorySpace.SMEM),
            ],
            out_specs=pl.BlockSpec(
                (1, c_out, t_out, tile_n), lambda b, j: (b, 0, 0, j)),
        ),
        compiler_params=pltpu.CompilerParams(
            dimension_semantics=("parallel", "parallel"),
        ),
        cost_estimate=pl.CostEstimate(
            flops=flops, transcendentals=0, bytes_accessed=int(bytes_accessed)),
    )(x_t, w_flat, b_flat)

    # Back to the module-native (B, C_out, num_nodes, t_out) layout.
    return jnp.transpose(out_t, (0, 1, 3, 2))


if __name__ == "__main__":
    key = jax.random.PRNGKey(0)

    # batch=2, cin=4, cout=8 (2 per branch), num_nodes=16, seq_len=16
    B, c_in, c_out, n_nodes, seq_len = 2, 4, 8, 16, 16
    dilation = 2
    cout_per = c_out // len(KERNEL_SET)

    keys = jax.random.split(key, 1 + 2 * len(KERNEL_SET))
    x = jax.random.normal(keys[0], (B, c_in, n_nodes, seq_len), dtype=jnp.float32)

    # Deterministic Conv2d-style init per branch: uniform(+/- 1/sqrt(fan_in)).
    weights, biases = [], []
    for j, k in enumerate(KERNEL_SET):
        fan_in = c_in * 1 * k
        bound = 1.0 / (fan_in ** 0.5)
        wj = jax.random.uniform(
            keys[1 + 2 * j], (cout_per, c_in, 1, k), jnp.float32, -bound, bound)
        bj = jax.random.uniform(
            keys[2 + 2 * j], (cout_per,), jnp.float32, -bound, bound)
        weights.append(wj)
        biases.append(bj)

    out = dilated_inception_pallas(x, weights, biases, dilation_factor=dilation)
    out = jax.block_until_ready(out)

    # Independent reference: four dilated convs, crop to shortest, concat.
    t_out = seq_len - dilation * (max(KERNEL_SET) - 1)
    refs = []
    for j, k in enumerate(KERNEL_SET):
        rj = jax.lax.conv_general_dilated(
            x,
            weights[j],
            window_strides=(1, 1),
            padding="VALID",
            rhs_dilation=(1, dilation),
            dimension_numbers=("NCHW", "OIHW", "NCHW"),
        ) + biases[j][None, :, None, None]
        refs.append(rj[..., -t_out:])
    ref = jnp.concatenate(refs, axis=1)

    assert out.shape == (B, c_out, n_nodes, t_out), out.shape
    assert jnp.allclose(out, ref, atol=1e-5, rtol=1e-5), float(
        jnp.max(jnp.abs(out - ref)))
    print("KERNEL_OK")
</pallas_src>

<mosaic_0001>
module attributes {stable_mosaic.version = 11 : i64} {
  func.func @_dilated_inception_kernel(%arg0: i32, %arg1: i32, %arg2: memref<1x4x16x16xf32, #tpu.memory_space<vmem>>, %arg3: memref<224xf32, #tpu.memory_space<smem>>, %arg4: memref<8xf32, #tpu.memory_space<smem>>, %arg5: memref<1x8x4x16xf32, #tpu.memory_space<vmem>>) attributes {dimension_semantics = [#tpu.dimension_semantics<parallel>, #tpu.dimension_semantics<parallel>], iteration_bounds = array<i64: 2, 1>, scalar_prefetch = 0 : i64, scratch_operands = 0 : i64, tpu.core_type = #tpu.core_type<tc>, window_params = [{transform_indices = @transform_0, window_bounds = array<i64: 1, 4, 16, 16>}, {transform_indices = @transform_1, window_bounds = array<i64: 224>}, {transform_indices = @transform_2, window_bounds = array<i64: 8>}, {transform_indices = @transform_3, window_bounds = array<i64: 1, 8, 4, 16>}]} {
    %c0 = arith.constant 0 : index
    %0 = memref.load %arg4[%c0] : memref<8xf32, #tpu.memory_space<smem>>
    %1 = vector.broadcast %0 : f32 to vector<4x16xf32>
    %c1 = arith.constant 1 : index
    %2 = memref.load %arg4[%c1] : memref<8xf32, #tpu.memory_space<smem>>
    %3 = vector.broadcast %2 : f32 to vector<4x16xf32>
    %c2 = arith.constant 2 : index
    %4 = memref.load %arg4[%c2] : memref<8xf32, #tpu.memory_space<smem>>
    %5 = vector.broadcast %4 : f32 to vector<4x16xf32>
    %c3 = arith.constant 3 : index
    %6 = memref.load %arg4[%c3] : memref<8xf32, #tpu.memory_space<smem>>
    %7 = vector.broadcast %6 : f32 to vector<4x16xf32>
    %c4 = arith.constant 4 : index
    %8 = memref.load %arg4[%c4] : memref<8xf32, #tpu.memory_space<smem>>
    %9 = vector.broadcast %8 : f32 to vector<4x16xf32>
    %c5 = arith.constant 5 : index
    %10 = memref.load %arg4[%c5] : memref<8xf32, #tpu.memory_space<smem>>
    %11 = vector.broadcast %10 : f32 to vector<4x16xf32>
    %c6 = arith.constant 6 : index
    %12 = memref.load %arg4[%c6] : memref<8xf32, #tpu.memory_space<smem>>
    %13 = vector.broadcast %12 : f32 to vector<4x16xf32>
    %c7 = arith.constant 7 : index
    %14 = memref.load %arg4[%c7] : memref<8xf32, #tpu.memory_space<smem>>
    %15 = vector.broadcast %14 : f32 to vector<4x16xf32>
    %c0_0 = arith.constant 0 : index
    %c0_1 = arith.constant 0 : index
    %c0_2 = arith.constant 0 : index
    %c0_3 = arith.constant 0 : index
    %16 = vector.load %arg2[%c0_0, %c0_1, %c0_2, %c0_3] : memref<1x4x16x16xf32, #tpu.memory_space<vmem>>, vector<1x1x4x16xf32>
    %17 = vector.shape_cast %16 : vector<1x1x4x16xf32> to vector<4x16xf32>
    %c24 = arith.constant 24 : index
    %18 = memref.load %arg3[%c24] : memref<224xf32, #tpu.memory_space<smem>>
    %19 = vector.broadcast %18 : f32 to vector<4x16xf32>
    %20 = arith.mulf %19, %17 : vector<4x16xf32>
    %21 = arith.addf %13, %20 : vector<4x16xf32>
    %c28 = arith.constant 28 : index
    %22 = memref.load %arg3[%c28] : memref<224xf32, #tpu.memory_space<smem>>
    %23 = vector.broadcast %22 : f32 to vector<4x16xf32>
    %24 = arith.mulf %23, %17 : vector<4x16xf32>
    %25 = arith.addf %15, %24 : vector<4x16xf32>
    %c0_4 = arith.constant 0 : index
    %c1_5 = arith.constant 1 : index
    %c0_6 = arith.constant 0 : index
    %c0_7 = arith.constant 0 : index
    %26 = vector.load %arg2[%c0_4, %c1_5, %c0_6, %c0_7] : memref<1x4x16x16xf32, #tpu.memory_space<vmem>>, vector<1x1x4x16xf32>
    %27 = vector.shape_cast %26 : vector<1x1x4x16xf32> to vector<4x16xf32>
    %c25 = arith.constant 25 : index
    %28 = memref.load %arg3[%c25] : memref<224xf32, #tpu.memory_space<smem>>
    %29 = vector.broadcast %28 : f32 to vector<4x16xf32>
    %30 = arith.mulf %29, %27 : vector<4x16xf32>
    %31 = arith.addf %21, %30 : vector<4x16xf32>
    %c29 = arith.constant 29 : index
    %32 = memref.load %arg3[%c29] : memref<224xf32, #tpu.memory_space<smem>>
    %33 = vector.broadcast %32 : f32 to vector<4x16xf32>
    %34 = arith.mulf %33, %27 : vector<4x16xf32>
    %35 = arith.addf %25, %34 : vector<4x16xf32>
    %c0_8 = arith.constant 0 : index
    %c2_9 = arith.constant 2 : index
    %c0_10 = arith.constant 0 : index
    %c0_11 = arith.constant 0 : index
    %36 = vector.load %arg2[%c0_8, %c2_9, %c0_10, %c0_11] : memref<1x4x16x16xf32, #tpu.memory_space<vmem>>, vector<1x1x4x16xf32>
    %37 = vector.shape_cast %36 : vector<1x1x4x16xf32> to vector<4x16xf32>
    %c26 = arith.constant 26 : index
    %38 = memref.load %arg3[%c26] : memref<224xf32, #tpu.memory_space<smem>>
    %39 = vector.broadcast %38 : f32 to vector<4x16xf32>
    %40 = arith.mulf %39, %37 : vector<4x16xf32>
    %41 = arith.addf %31, %40 : vector<4x16xf32>
    %c30 = arith.constant 30 : index
    %42 = memref.load %arg3[%c30] : memref<224xf32, #tpu.memory_space<smem>>
    %43 = vector.broadcast %42 : f32 to vector<4x16xf32>
    %44 = arith.mulf %43, %37 : vector<4x16xf32>
    %45 = arith.addf %35, %44 : vector<4x16xf32>
    %c0_12 = arith.constant 0 : index
    %c3_13 = arith.constant 3 : index
    %c0_14 = arith.constant 0 : index
    %c0_15 = arith.constant 0 : index
    %46 = vector.load %arg2[%c0_12, %c3_13, %c0_14, %c0_15] : memref<1x4x16x16xf32, #tpu.memory_space<vmem>>, vector<1x1x4x16xf32>
    %47 = vector.shape_cast %46 : vector<1x1x4x16xf32> to vector<4x16xf32>
    %c27 = arith.constant 27 : index
    %48 = memref.load %arg3[%c27] : memref<224xf32, #tpu.memory_space<smem>>
    %49 = vector.broadcast %48 : f32 to vector<4x16xf32>
    %50 = arith.mulf %49, %47 : vector<4x16xf32>
    %51 = arith.addf %41, %50 : vector<4x16xf32>
    %c31 = arith.constant 31 : index
    %52 = memref.load %arg3[%c31] : memref<224xf32, #tpu.memory_space<smem>>
    %53 = vector.broadcast %52 : f32 to vector<4x16xf32>
    %54 = arith.mulf %53, %47 : vector<4x16xf32>
    %55 = arith.addf %45, %54 : vector<4x16xf32>
    %c0_16 = arith.constant 0 : index
    %c0_17 = arith.constant 0 : index
    %c2_18 = arith.constant 2 : index
    %c0_19 = arith.constant 0 : index
    %56 = vector.load %arg2[%c0_16, %c0_17, %c2_18, %c0_19] : memref<1x4x16x16xf32, #tpu.memory_space<vmem>>, vector<1x1x4x16xf32>
    %57 = vector.shape_cast %56 : vector<1x1x4x16xf32> to vector<4x16xf32>
    %c48 = arith.constant 48 : index
    %58 = memref.load %arg3[%c48] : memref<224xf32, #tpu.memory_space<smem>>
    %59 = vector.broadcast %58 : f32 to vector<4x16xf32>
    %60 = arith.mulf %59, %57 : vector<4x16xf32>
    %61 = arith.addf %9, %60 : vector<4x16xf32>
    %c52 = arith.constant 52 : index
    %62 = memref.load %arg3[%c52] : memref<224xf32, #tpu.memory_space<smem>>
    %63 = vector.broadcast %62 : f32 to vector<4x16xf32>
    %64 = arith.mulf %63, %57 : vector<4x16xf32>
    %65 = arith.addf %11, %64 : vector<4x16xf32>
    %c56 = arith.constant 56 : index
    %66 = memref.load %arg3[%c56] : memref<224xf32, #tpu.memory_space<smem>>
    %67 = vector.broadcast %66 : f32 to vector<4x16xf32>
    %68 = arith.mulf %67, %57 : vector<4x16xf32>
    %69 = arith.addf %51, %68 : vector<4x16xf32>
    %c60 = arith.constant 60 : index
    %70 = memref.load %arg3[%c60] : memref<224xf32, #tpu.memory_space<smem>>
    %71 = vector.broadcast %70 : f32 to vector<4x16xf32>
    %72 = arith.mulf %71, %57 : vector<4x16xf32>
    %73 = arith.addf %55, %72 : vector<4x16xf32>
    %c0_20 = arith.constant 0 : index
    %c1_21 = arith.constant 1 : index
    %c2_22 = arith.constant 2 : index
    %c0_23 = arith.constant 0 : index
    %74 = vector.load %arg2[%c0_20, %c1_21, %c2_22, %c0_23] : memref<1x4x16x16xf32, #tpu.memory_space<vmem>>, vector<1x1x4x16xf32>
    %75 = vector.shape_cast %74 : vector<1x1x4x16xf32> to vector<4x16xf32>
    %c49 = arith.constant 49 : index
    %76 = memref.load %arg3[%c49] : memref<224xf32, #tpu.memory_space<smem>>
    %77 = vector.broadcast %76 : f32 to vector<4x16xf32>
    %78 = arith.mulf %77, %75 : vector<4x16xf32>
    %79 = arith.addf %61, %78 : vector<4x16xf32>
    %c53 = arith.constant 53 : index
    %80 = memref.load %arg3[%c53] : memref<224xf32, #tpu.memory_space<smem>>
    %81 = vector.broadcast %80 : f32 to vector<4x16xf32>
    %82 = arith.mulf %81, %75 : vector<4x16xf32>
    %83 = arith.addf %65, %82 : vector<4x16xf32>
    %c57 = arith.constant 57 : index
    %84 = memref.load %arg3[%c57] : memref<224xf32, #tpu.memory_space<smem>>
    %85 = vector.broadcast %84 : f32 to vector<4x16xf32>
    %86 = arith.mulf %85, %75 : vector<4x16xf32>
    %87 = arith.addf %69, %86 : vector<4x16xf32>
    %c61 = arith.constant 61 : index
    %88 = memref.load %arg3[%c61] : memref<224xf32, #tpu.memory_space<smem>>
    %89 = vector.broadcast %88 : f32 to vector<4x16xf32>
    %90 = arith.mulf %89, %75 : vector<4x16xf32>
    %91 = arith.addf %73, %90 : vector<4x16xf32>
    %c0_24 = arith.constant 0 : index
    %c2_25 = arith.constant 2 : index
    %c2_26 = arith.constant 2 : index
    %c0_27 = arith.constant 0 : index
    %92 = vector.load %arg2[%c0_24, %c2_25, %c2_26, %c0_27] : memref<1x4x16x16xf32, #tpu.memory_space<vmem>>, vector<1x1x4x16xf32>
    %93 = vector.shape_cast %92 : vector<1x1x4x16xf32> to vector<4x16xf32>
    %c50 = arith.constant 50 : index
    %94 = memref.load %arg3[%c50] : memref<224xf32, #tpu.memory_space<smem>>
    %95 = vector.broadcast %94 : f32 to vector<4x16xf32>
    %96 = arith.mulf %95, %93 : vector<4x16xf32>
    %97 = arith.addf %79, %96 : vector<4x16xf32>
    %c54 = arith.constant 54 : index
    %98 = memref.load %arg3[%c54] : memref<224xf32, #tpu.memory_space<smem>>
    %99 = vector.broadcast %98 : f32 to vector<4x16xf32>
    %100 = arith.mulf %99, %93 : vector<4x16xf32>
    %101 = arith.addf %83, %100 : vector<4x16xf32>
    %c58 = arith.constant 58 : index
    %102 = memref.load %arg3[%c58] : memref<224xf32, #tpu.memory_space<smem>>
    %103 = vector.broadcast %102 : f32 to vector<4x16xf32>
    %104 = arith.mulf %103, %93 : vector<4x16xf32>
    %105 = arith.addf %87, %104 : vector<4x16xf32>
    %c62 = arith.constant 62 : index
    %106 = memref.load %arg3[%c62] : memref<224xf32, #tpu.memory_space<smem>>
    %107 = vector.broadcast %106 : f32 to vector<4x16xf32>
    %108 = arith.mulf %107, %93 : vector<4x16xf32>
    %109 = arith.addf %91, %108 : vector<4x16xf32>
    %c0_28 = arith.constant 0 : index
    %c3_29 = arith.constant 3 : index
    %c2_30 = arith.constant 2 : index
    %c0_31 = arith.constant 0 : index
    %110 = vector.load %arg2[%c0_28, %c3_29, %c2_30, %c0_31] : memref<1x4x16x16xf32, #tpu.memory_space<vmem>>, vector<1x1x4x16xf32>
    %111 = vector.shape_cast %110 : vector<1x1x4x16xf32> to vector<4x16xf32>
    %c51 = arith.constant 51 : index
    %112 = memref.load %arg3[%c51] : memref<224xf32, #tpu.memory_space<smem>>
    %113 = vector.broadcast %112 : f32 to vector<4x16xf32>
    %114 = arith.mulf %113, %111 : vector<4x16xf32>
    %115 = arith.addf %97, %114 : vector<4x16xf32>
    %c55 = arith.constant 55 : index
    %116 = memref.load %arg3[%c55] : memref<224xf32, #tpu.memory_space<smem>>
    %117 = vector.broadcast %116 : f32 to vector<4x16xf32>
    %118 = arith.mulf %117, %111 : vector<4x16xf32>
    %119 = arith.addf %101, %118 : vector<4x16xf32>
    %c59 = arith.constant 59 : index
    %120 = memref.load %arg3[%c59] : memref<224xf32, #tpu.memory_space<smem>>
    %121 = vector.broadcast %120 : f32 to vector<4x16xf32>
    %122 = arith.mulf %121, %111 : vector<4x16xf32>
    %123 = arith.addf %105, %122 : vector<4x16xf32>
    %c63 = arith.constant 63 : index
    %124 = memref.load %arg3[%c63] : memref<224xf32, #tpu.memory_space<smem>>
    %125 = vector.broadcast %124 : f32 to vector<4x16xf32>
    %126 = arith.mulf %125, %111 : vector<4x16xf32>
    %127 = arith.addf %109, %126 : vector<4x16xf32>
    %c0_32 = arith.constant 0 : index
    %c0_33 = arith.constant 0 : index
    %c4_34 = arith.constant 4 : index
    %c0_35 = arith.constant 0 : index
    %128 = vector.load %arg2[%c0_32, %c0_33, %c4_34, %c0_35] : memref<1x4x16x16xf32, #tpu.memory_space<vmem>>, vector<1x1x4x16xf32>
    %129 = vector.shape_cast %128 : vector<1x1x4x16xf32> to vector<4x16xf32>
    %c80 = arith.constant 80 : index
    %130 = memref.load %arg3[%c80] : memref<224xf32, #tpu.memory_space<smem>>
    %131 = vector.broadcast %130 : f32 to vector<4x16xf32>
    %132 = arith.mulf %131, %129 : vector<4x16xf32>
    %133 = arith.addf %115, %132 : vector<4x16xf32>
    %c84 = arith.constant 84 : index
    %134 = memref.load %arg3[%c84] : memref<224xf32, #tpu.memory_space<smem>>
    %135 = vector.broadcast %134 : f32 to vector<4x16xf32>
    %136 = arith.mulf %135, %129 : vector<4x16xf32>
    %137 = arith.addf %119, %136 : vector<4x16xf32>
    %c88 = arith.constant 88 : index
    %138 = memref.load %arg3[%c88] : memref<224xf32, #tpu.memory_space<smem>>
    %139 = vector.broadcast %138 : f32 to vector<4x16xf32>
    %140 = arith.mulf %139, %129 : vector<4x16xf32>
    %141 = arith.addf %123, %140 : vector<4x16xf32>
    %c92 = arith.constant 92 : index
    %142 = memref.load %arg3[%c92] : memref<224xf32, #tpu.memory_space<smem>>
    %143 = vector.broadcast %142 : f32 to vector<4x16xf32>
    %144 = arith.mulf %143, %129 : vector<4x16xf32>
    %145 = arith.addf %127, %144 : vector<4x16xf32>
    %c0_36 = arith.constant 0 : index
    %c1_37 = arith.constant 1 : index
    %c4_38 = arith.constant 4 : index
    %c0_39 = arith.constant 0 : index
    %146 = vector.load %arg2[%c0_36, %c1_37, %c4_38, %c0_39] : memref<1x4x16x16xf32, #tpu.memory_space<vmem>>, vector<1x1x4x16xf32>
    %147 = vector.shape_cast %146 : vector<1x1x4x16xf32> to vector<4x16xf32>
    %c81 = arith.constant 81 : index
    %148 = memref.load %arg3[%c81] : memref<224xf32, #tpu.memory_space<smem>>
    %149 = vector.broadcast %148 : f32 to vector<4x16xf32>
    %150 = arith.mulf %149, %147 : vector<4x16xf32>
    %151 = arith.addf %133, %150 : vector<4x16xf32>
    %c85 = arith.constant 85 : index
    %152 = memref.load %arg3[%c85] : memref<224xf32, #tpu.memory_space<smem>>
    %153 = vector.broadcast %152 : f32 to vector<4x16xf32>
    %154 = arith.mulf %153, %147 : vector<4x16xf32>
    %155 = arith.addf %137, %154 : vector<4x16xf32>
    %c89 = arith.constant 89 : index
    %156 = memref.load %arg3[%c89] : memref<224xf32, #tpu.memory_space<smem>>
    %157 = vector.broadcast %156 : f32 to vector<4x16xf32>
    %158 = arith.mulf %157, %147 : vector<4x16xf32>
    %159 = arith.addf %141, %158 : vector<4x16xf32>
    %c93 = arith.constant 93 : index
    %160 = memref.load %arg3[%c93] : memref<224xf32, #tpu.memory_space<smem>>
    %161 = vector.broadcast %160 : f32 to vector<4x16xf32>
    %162 = arith.mulf %161, %147 : vector<4x16xf32>
    %163 = arith.addf %145, %162 : vector<4x16xf32>
    %c0_40 = arith.constant 0 : index
    %c2_41 = arith.constant 2 : index
    %c4_42 = arith.constant 4 : index
    %c0_43 = arith.constant 0 : index
    %164 = vector.load %arg2[%c0_40, %c2_41, %c4_42, %c0_43] : memref<1x4x16x16xf32, #tpu.memory_space<vmem>>, vector<1x1x4x16xf32>
    %165 = vector.shape_cast %164 : vector<1x1x4x16xf32> to vector<4x16xf32>
    %c82 = arith.constant 82 : index
    %166 = memref.load %arg3[%c82] : memref<224xf32, #tpu.memory_space<smem>>
    %167 = vector.broadcast %166 : f32 to vector<4x16xf32>
    %168 = arith.mulf %167, %165 : vector<4x16xf32>
    %169 = arith.addf %151, %168 : vector<4x16xf32>
    %c86 = arith.constant 86 : index
    %170 = memref.load %arg3[%c86] : memref<224xf32, #tpu.memory_space<smem>>
    %171 = vector.broadcast %170 : f32 to vector<4x16xf32>
    %172 = arith.mulf %171, %165 : vector<4x16xf32>
    %173 = arith.addf %155, %172 : vector<4x16xf32>
    %c90 = arith.constant 90 : index
    %174 = memref.load %arg3[%c90] : memref<224xf32, #tpu.memory_space<smem>>
    %175 = vector.broadcast %174 : f32 to vector<4x16xf32>
    %176 = arith.mulf %175, %165 : vector<4x16xf32>
    %177 = arith.addf %159, %176 : vector<4x16xf32>
    %c94 = arith.constant 94 : index
    %178 = memref.load %arg3[%c94] : memref<224xf32, #tpu.memory_space<smem>>
    %179 = vector.broadcast %178 : f32 to vector<4x16xf32>
    %180 = arith.mulf %179, %165 : vector<4x16xf32>
    %181 = arith.addf %163, %180 : vector<4x16xf32>
    %c0_44 = arith.constant 0 : index
    %c3_45 = arith.constant 3 : index
    %c4_46 = arith.constant 4 : index
    %c0_47 = arith.constant 0 : index
    %182 = vector.load %arg2[%c0_44, %c3_45, %c4_46, %c0_47] : memref<1x4x16x16xf32, #tpu.memory_space<vmem>>, vector<1x1x4x16xf32>
    %183 = vector.shape_cast %182 : vector<1x1x4x16xf32> to vector<4x16xf32>
    %c83 = arith.constant 83 : index
    %184 = memref.load %arg3[%c83] : memref<224xf32, #tpu.memory_space<smem>>
    %185 = vector.broadcast %184 : f32 to vector<4x16xf32>
    %186 = arith.mulf %185, %183 : vector<4x16xf32>
    %187 = arith.addf %169, %186 : vector<4x16xf32>
    %c87 = arith.constant 87 : index
    %188 = memref.load %arg3[%c87] : memref<224xf32, #tpu.memory_space<smem>>
    %189 = vector.broadcast %188 : f32 to vector<4x16xf32>
    %190 = arith.mulf %189, %183 : vector<4x16xf32>
    %191 = arith.addf %173, %190 : vector<4x16xf32>
    %c91 = arith.constant 91 : index
    %192 = memref.load %arg3[%c91] : memref<224xf32, #tpu.memory_space<smem>>
    %193 = vector.broadcast %192 : f32 to vector<4x16xf32>
    %194 = arith.mulf %193, %183 : vector<4x16xf32>
    %195 = arith.addf %177, %194 : vector<4x16xf32>
    %c95 = arith.constant 95 : index
    %196 = memref.load %arg3[%c95] : memref<224xf32, #tpu.memory_space<smem>>
    %197 = vector.broadcast %196 : f32 to vector<4x16xf32>
    %198 = arith.mulf %197, %183 : vector<4x16xf32>
    %199 = arith.addf %181, %198 : vector<4x16xf32>
    %c0_48 = arith.constant 0 : index
    %c0_49 = arith.constant 0 : index
    %c6_50 = arith.constant 6 : index
    %c0_51 = arith.constant 0 : index
    %200 = vector.load %arg2[%c0_48, %c0_49, %c6_50, %c0_51] : memref<1x4x16x16xf32, #tpu.memory_space<vmem>>, vector<1x1x4x16xf32>
    %201 = vector.shape_cast %200 : vector<1x1x4x16xf32> to vector<4x16xf32>
    %c112 = arith.constant 112 : index
    %202 = memref.load %arg3[%c112] : memref<224xf32, #tpu.memory_space<smem>>
    %203 = vector.broadcast %202 : f32 to vector<4x16xf32>
    %204 = arith.mulf %203, %201 : vector<4x16xf32>
    %205 = arith.addf %187, %204 : vector<4x16xf32>
    %c116 = arith.constant 116 : index
    %206 = memref.load %arg3[%c116] : memref<224xf32, #tpu.memory_space<smem>>
    %207 = vector.broadcast %206 : f32 to vector<4x16xf32>
    %208 = arith.mulf %207, %201 : vector<4x16xf32>
    %209 = arith.addf %191, %208 : vector<4x16xf32>
    %c120 = arith.constant 120 : index
    %210 = memref.load %arg3[%c120] : memref<224xf32, #tpu.memory_space<smem>>
    %211 = vector.broadcast %210 : f32 to vector<4x16xf32>
    %212 = arith.mulf %211, %201 : vector<4x16xf32>
    %213 = arith.addf %195, %212 : vector<4x16xf32>
    %c124 = arith.constant 124 : index
    %214 = memref.load %arg3[%c124] : memref<224xf32, #tpu.memory_space<smem>>
    %215 = vector.broadcast %214 : f32 to vector<4x16xf32>
    %216 = arith.mulf %215, %201 : vector<4x16xf32>
    %217 = arith.addf %199, %216 : vector<4x16xf32>
    %c0_52 = arith.constant 0 : index
    %c1_53 = arith.constant 1 : index
    %c6_54 = arith.constant 6 : index
    %c0_55 = arith.constant 0 : index
    %218 = vector.load %arg2[%c0_52, %c1_53, %c6_54, %c0_55] : memref<1x4x16x16xf32, #tpu.memory_space<vmem>>, vector<1x1x4x16xf32>
    %219 = vector.shape_cast %218 : vector<1x1x4x16xf32> to vector<4x16xf32>
    %c113 = arith.constant 113 : index
    %220 = memref.load %arg3[%c113] : memref<224xf32, #tpu.memory_space<smem>>
    %221 = vector.broadcast %220 : f32 to vector<4x16xf32>
    %222 = arith.mulf %221, %219 : vector<4x16xf32>
    %223 = arith.addf %205, %222 : vector<4x16xf32>
    %c117 = arith.constant 117 : index
    %224 = memref.load %arg3[%c117] : memref<224xf32, #tpu.memory_space<smem>>
    %225 = vector.broadcast %224 : f32 to vector<4x16xf32>
    %226 = arith.mulf %225, %219 : vector<4x16xf32>
    %227 = arith.addf %209, %226 : vector<4x16xf32>
    %c121 = arith.constant 121 : index
    %228 = memref.load %arg3[%c121] : memref<224xf32, #tpu.memory_space<smem>>
    %229 = vector.broadcast %228 : f32 to vector<4x16xf32>
    %230 = arith.mulf %229, %219 : vector<4x16xf32>
    %231 = arith.addf %213, %230 : vector<4x16xf32>
    %c125 = arith.constant 125 : index
    %232 = memref.load %arg3[%c125] : memref<224xf32, #tpu.memory_space<smem>>
    %233 = vector.broadcast %232 : f32 to vector<4x16xf32>
    %234 = arith.mulf %233, %219 : vector<4x16xf32>
    %235 = arith.addf %217, %234 : vector<4x16xf32>
    %c0_56 = arith.constant 0 : index
    %c2_57 = arith.constant 2 : index
    %c6_58 = arith.constant 6 : index
    %c0_59 = arith.constant 0 : index
    %236 = vector.load %arg2[%c0_56, %c2_57, %c6_58, %c0_59] : memref<1x4x16x16xf32, #tpu.memory_space<vmem>>, vector<1x1x4x16xf32>
    %237 = vector.shape_cast %236 : vector<1x1x4x16xf32> to vector<4x16xf32>
    %c114 = arith.constant 114 : index
    %238 = memref.load %arg3[%c114] : memref<224xf32, #tpu.memory_space<smem>>
    %239 = vector.broadcast %238 : f32 to vector<4x16xf32>
    %240 = arith.mulf %239, %237 : vector<4x16xf32>
    %241 = arith.addf %223, %240 : vector<4x16xf32>
    %c118 = arith.constant 118 : index
    %242 = memref.load %arg3[%c118] : memref<224xf32, #tpu.memory_space<smem>>
    %243 = vector.broadcast %242 : f32 to vector<4x16xf32>
    %244 = arith.mulf %243, %237 : vector<4x16xf32>
    %245 = arith.addf %227, %244 : vector<4x16xf32>
    %c122 = arith.constant 122 : index
    %246 = memref.load %arg3[%c122] : memref<224xf32, #tpu.memory_space<smem>>
    %247 = vector.broadcast %246 : f32 to vector<4x16xf32>
    %248 = arith.mulf %247, %237 : vector<4x16xf32>
    %249 = arith.addf %231, %248 : vector<4x16xf32>
    %c126 = arith.constant 126 : index
    %250 = memref.load %arg3[%c126] : memref<224xf32, #tpu.memory_space<smem>>
    %251 = vector.broadcast %250 : f32 to vector<4x16xf32>
    %252 = arith.mulf %251, %237 : vector<4x16xf32>
    %253 = arith.addf %235, %252 : vector<4x16xf32>
    %c0_60 = arith.constant 0 : index
    %c3_61 = arith.constant 3 : index
    %c6_62 = arith.constant 6 : index
    %c0_63 = arith.constant 0 : index
    %254 = vector.load %arg2[%c0_60, %c3_61, %c6_62, %c0_63] : memref<1x4x16x16xf32, #tpu.memory_space<vmem>>, vector<1x1x4x16xf32>
    %255 = vector.shape_cast %254 : vector<1x1x4x16xf32> to vector<4x16xf32>
    %c115 = arith.constant 115 : index
    %256 = memref.load %arg3[%c115] : memref<224xf32, #tpu.memory_space<smem>>
    %257 = vector.broadcast %256 : f32 to vector<4x16xf32>
    %258 = arith.mulf %257, %255 : vector<4x16xf32>
    %259 = arith.addf %241, %258 : vector<4x16xf32>
    %c119 = arith.constant 119 : index
    %260 = memref.load %arg3[%c119] : memref<224xf32, #tpu.memory_space<smem>>
    %261 = vector.broadcast %260 : f32 to vector<4x16xf32>
    %262 = arith.mulf %261, %255 : vector<4x16xf32>
    %263 = arith.addf %245, %262 : vector<4x16xf32>
    %c123 = arith.constant 123 : index
    %264 = memref.load %arg3[%c123] : memref<224xf32, #tpu.memory_space<smem>>
    %265 = vector.broadcast %264 : f32 to vector<4x16xf32>
    %266 = arith.mulf %265, %255 : vector<4x16xf32>
    %267 = arith.addf %249, %266 : vector<4x16xf32>
    %c127 = arith.constant 127 : index
    %268 = memref.load %arg3[%c127] : memref<224xf32, #tpu.memory_space<smem>>
    %269 = vector.broadcast %268 : f32 to vector<4x16xf32>
    %270 = arith.mulf %269, %255 : vector<4x16xf32>
    %271 = arith.addf %253, %270 : vector<4x16xf32>
    %c0_64 = arith.constant 0 : index
    %c0_65 = arith.constant 0 : index
    %c8 = arith.constant 8 : index
    %c0_66 = arith.constant 0 : index
    %272 = vector.load %arg2[%c0_64, %c0_65, %c8, %c0_66] : memref<1x4x16x16xf32, #tpu.memory_space<vmem>>, vector<1x1x4x16xf32>
    %273 = vector.shape_cast %272 : vector<1x1x4x16xf32> to vector<4x16xf32>
    %c136 = arith.constant 136 : index
    %274 = memref.load %arg3[%c136] : memref<224xf32, #tpu.memory_space<smem>>
    %275 = vector.broadcast %274 : f32 to vector<4x16xf32>
    %276 = arith.mulf %275, %273 : vector<4x16xf32>
    %277 = arith.addf %5, %276 : vector<4x16xf32>
    %c140 = arith.constant 140 : index
    %278 = memref.load %arg3[%c140] : memref<224xf32, #tpu.memory_space<smem>>
    %279 = vector.broadcast %278 : f32 to vector<4x16xf32>
    %280 = arith.mulf %279, %273 : vector<4x16xf32>
    %281 = arith.addf %7, %280 : vector<4x16xf32>
    %c144 = arith.constant 144 : index
    %282 = memref.load %arg3[%c144] : memref<224xf32, #tpu.memory_space<smem>>
    %283 = vector.broadcast %282 : f32 to vector<4x16xf32>
    %284 = arith.mulf %283, %273 : vector<4x16xf32>
    %285 = arith.addf %259, %284 : vector<4x16xf32>
    %c148 = arith.constant 148 : index
    %286 = memref.load %arg3[%c148] : memref<224xf32, #tpu.memory_space<smem>>
    %287 = vector.broadcast %286 : f32 to vector<4x16xf32>
    %288 = arith.mulf %287, %273 : vector<4x16xf32>
    %289 = arith.addf %263, %288 : vector<4x16xf32>
    %c152 = arith.constant 152 : index
    %290 = memref.load %arg3[%c152] : memref<224xf32, #tpu.memory_space<smem>>
    %291 = vector.broadcast %290 : f32 to vector<4x16xf32>
    %292 = arith.mulf %291, %273 : vector<4x16xf32>
    %293 = arith.addf %267, %292 : vector<4x16xf32>
    %c156 = arith.constant 156 : index
    %294 = memref.load %arg3[%c156] : memref<224xf32, #tpu.memory_space<smem>>
    %295 = vector.broadcast %294 : f32 to vector<4x16xf32>
    %296 = arith.mulf %295, %273 : vector<4x16xf32>
    %297 = arith.addf %271, %296 : vector<4x16xf32>
    %c0_67 = arith.constant 0 : index
    %c1_68 = arith.constant 1 : index
    %c8_69 = arith.constant 8 : index
    %c0_70 = arith.constant 0 : index
    %298 = vector.load %arg2[%c0_67, %c1_68, %c8_69, %c0_70] : memref<1x4x16x16xf32, #tpu.memory_space<vmem>>, vector<1x1x4x16xf32>
    %299 = vector.shape_cast %298 : vector<1x1x4x16xf32> to vector<4x16xf32>
    %c137 = arith.constant 137 : index
    %300 = memref.load %arg3[%c137] : memref<224xf32, #tpu.memory_space<smem>>
    %301 = vector.broadcast %300 : f32 to vector<4x16xf32>
    %302 = arith.mulf %301, %299 : vector<4x16xf32>
    %303 = arith.addf %277, %302 : vector<4x16xf32>
    %c141 = arith.constant 141 : index
    %304 = memref.load %arg3[%c141] : memref<224xf32, #tpu.memory_space<smem>>
    %305 = vector.broadcast %304 : f32 to vector<4x16xf32>
    %306 = arith.mulf %305, %299 : vector<4x16xf32>
    %307 = arith.addf %281, %306 : vector<4x16xf32>
    %c145 = arith.constant 145 : index
    %308 = memref.load %arg3[%c145] : memref<224xf32, #tpu.memory_space<smem>>
    %309 = vector.broadcast %308 : f32 to vector<4x16xf32>
    %310 = arith.mulf %309, %299 : vector<4x16xf32>
    %311 = arith.addf %285, %310 : vector<4x16xf32>
    %c149 = arith.constant 149 : index
    %312 = memref.load %arg3[%c149] : memref<224xf32, #tpu.memory_space<smem>>
    %313 = vector.broadcast %312 : f32 to vector<4x16xf32>
    %314 = arith.mulf %313, %299 : vector<4x16xf32>
    %315 = arith.addf %289, %314 : vector<4x16xf32>
    %c153 = arith.constant 153 : index
    %316 = memref.load %arg3[%c153] : memref<224xf32, #tpu.memory_space<smem>>
    %317 = vector.broadcast %316 : f32 to vector<4x16xf32>
    %318 = arith.mulf %317, %299 : vector<4x16xf32>
    %319 = arith.addf %293, %318 : vector<4x16xf32>
    %c157 = arith.constant 157 : index
    %320 = memref.load %arg3[%c157] : memref<224xf32, #tpu.memory_space<smem>>
    %321 = vector.broadcast %320 : f32 to vector<4x16xf32>
    %322 = arith.mulf %321, %299 : vector<4x16xf32>
    %323 = arith.addf %297, %322 : vector<4x16xf32>
    %c0_71 = arith.constant 0 : index
    %c2_72 = arith.constant 2 : index
    %c8_73 = arith.constant 8 : index
    %c0_74 = arith.constant 0 : index
    %324 = vector.load %arg2[%c0_71, %c2_72, %c8_73, %c0_74] : memref<1x4x16x16xf32, #tpu.memory_space<vmem>>, vector<1x1x4x16xf32>
    %325 = vector.shape_cast %324 : vector<1x1x4x16xf32> to vector<4x16xf32>
    %c138 = arith.constant 138 : index
    %326 = memref.load %arg3[%c138] : memref<224xf32, #tpu.memory_space<smem>>
    %327 = vector.broadcast %326 : f32 to vector<4x16xf32>
    %328 = arith.mulf %327, %325 : vector<4x16xf32>
    %329 = arith.addf %303, %328 : vector<4x16xf32>
    %c142 = arith.constant 142 : index
    %330 = memref.load %arg3[%c142] : memref<224xf32, #tpu.memory_space<smem>>
    %331 = vector.broadcast %330 : f32 to vector<4x16xf32>
    %332 = arith.mulf %331, %325 : vector<4x16xf32>
    %333 = arith.addf %307, %332 : vector<4x16xf32>
    %c146 = arith.constant 146 : index
    %334 = memref.load %arg3[%c146] : memref<224xf32, #tpu.memory_space<smem>>
    %335 = vector.broadcast %334 : f32 to vector<4x16xf32>
    %336 = arith.mulf %335, %325 : vector<4x16xf32>
    %337 = arith.addf %311, %336 : vector<4x16xf32>
    %c150 = arith.constant 150 : index
    %338 = memref.load %arg3[%c150] : memref<224xf32, #tpu.memory_space<smem>>
    %339 = vector.broadcast %338 : f32 to vector<4x16xf32>
    %340 = arith.mulf %339, %325 : vector<4x16xf32>
    %341 = arith.addf %315, %340 : vector<4x16xf32>
    %c154 = arith.constant 154 : index
    %342 = memref.load %arg3[%c154] : memref<224xf32, #tpu.memory_space<smem>>
    %343 = vector.broadcast %342 : f32 to vector<4x16xf32>
    %344 = arith.mulf %343, %325 : vector<4x16xf32>
    %345 = arith.addf %319, %344 : vector<4x16xf32>
    %c158 = arith.constant 158 : index
    %346 = memref.load %arg3[%c158] : memref<224xf32, #tpu.memory_space<smem>>
    %347 = vector.broadcast %346 : f32 to vector<4x16xf32>
    %348 = arith.mulf %347, %325 : vector<4x16xf32>
    %349 = arith.addf %323, %348 : vector<4x16xf32>
    %c0_75 = arith.constant 0 : index
    %c3_76 = arith.constant 3 : index
    %c8_77 = arith.constant 8 : index
    %c0_78 = arith.constant 0 : index
    %350 = vector.load %arg2[%c0_75, %c3_76, %c8_77, %c0_78] : memref<1x4x16x16xf32, #tpu.memory_space<vmem>>, vector<1x1x4x16xf32>
    %351 = vector.shape_cast %350 : vector<1x1x4x16xf32> to vector<4x16xf32>
    %c139 = arith.constant 139 : index
    %352 = memref.load %arg3[%c139] : memref<224xf32, #tpu.memory_space<smem>>
    %353 = vector.broadcast %352 : f32 to vector<4x16xf32>
    %354 = arith.mulf %353, %351 : vector<4x16xf32>
    %355 = arith.addf %329, %354 : vector<4x16xf32>
    %c143 = arith.constant 143 : index
    %356 = memref.load %arg3[%c143] : memref<224xf32, #tpu.memory_space<smem>>
    %357 = vector.broadcast %356 : f32 to vector<4x16xf32>
    %358 = arith.mulf %357, %351 : vector<4x16xf32>
    %359 = arith.addf %333, %358 : vector<4x16xf32>
    %c147 = arith.constant 147 : index
    %360 = memref.load %arg3[%c147] : memref<224xf32, #tpu.memory_space<smem>>
    %361 = vector.broadcast %360 : f32 to vector<4x16xf32>
    %362 = arith.mulf %361, %351 : vector<4x16xf32>
    %363 = arith.addf %337, %362 : vector<4x16xf32>
    %c151 = arith.constant 151 : index
    %364 = memref.load %arg3[%c151] : memref<224xf32, #tpu.memory_space<smem>>
    %365 = vector.broadcast %364 : f32 to vector<4x16xf32>
    %366 = arith.mulf %365, %351 : vector<4x16xf32>
    %367 = arith.addf %341, %366 : vector<4x16xf32>
    %c155 = arith.constant 155 : index
    %368 = memref.load %arg3[%c155] : memref<224xf32, #tpu.memory_space<smem>>
    %369 = vector.broadcast %368 : f32 to vector<4x16xf32>
    %370 = arith.mulf %369, %351 : vector<4x16xf32>
    %371 = arith.addf %345, %370 : vector<4x16xf32>
    %c159 = arith.constant 159 : index
    %372 = memref.load %arg3[%c159] : memref<224xf32, #tpu.memory_space<smem>>
    %373 = vector.broadcast %372 : f32 to vector<4x16xf32>
    %374 = arith.mulf %373, %351 : vector<4x16xf32>
    %375 = arith.addf %349, %374 : vector<4x16xf32>
    %c0_79 = arith.constant 0 : index
    %c0_80 = arith.constant 0 : index
    %c10 = arith.constant 10 : index
    %c0_81 = arith.constant 0 : index
    %376 = vector.load %arg2[%c0_79, %c0_80, %c10, %c0_81] : memref<1x4x16x16xf32, #tpu.memory_space<vmem>>, vector<1x1x4x16xf32>
    %377 = vector.shape_cast %376 : vector<1x1x4x16xf32> to vector<4x16xf32>
    %c160 = arith.constant 160 : index
    %378 = memref.load %arg3[%c160] : memref<224xf32, #tpu.memory_space<smem>>
    %379 = vector.broadcast %378 : f32 to vector<4x16xf32>
    %380 = arith.mulf %379, %377 : vector<4x16xf32>
    %381 = arith.addf %1, %380 : vector<4x16xf32>
    %c164 = arith.constant 164 : index
    %382 = memref.load %arg3[%c164] : memref<224xf32, #tpu.memory_space<smem>>
    %383 = vector.broadcast %382 : f32 to vector<4x16xf32>
    %384 = arith.mulf %383, %377 : vector<4x16xf32>
    %385 = arith.addf %3, %384 : vector<4x16xf32>
    %c168 = arith.constant 168 : index
    %386 = memref.load %arg3[%c168] : memref<224xf32, #tpu.memory_space<smem>>
    %387 = vector.broadcast %386 : f32 to vector<4x16xf32>
    %388 = arith.mulf %387, %377 : vector<4x16xf32>
    %389 = arith.addf %355, %388 : vector<4x16xf32>
    %c172 = arith.constant 172 : index
    %390 = memref.load %arg3[%c172] : memref<224xf32, #tpu.memory_space<smem>>
    %391 = vector.broadcast %390 : f32 to vector<4x16xf32>
    %392 = arith.mulf %391, %377 : vector<4x16xf32>
    %393 = arith.addf %359, %392 : vector<4x16xf32>
    %c176 = arith.constant 176 : index
    %394 = memref.load %arg3[%c176] : memref<224xf32, #tpu.memory_space<smem>>
    %395 = vector.broadcast %394 : f32 to vector<4x16xf32>
    %396 = arith.mulf %395, %377 : vector<4x16xf32>
    %397 = arith.addf %363, %396 : vector<4x16xf32>
    %c180 = arith.constant 180 : index
    %398 = memref.load %arg3[%c180] : memref<224xf32, #tpu.memory_space<smem>>
    %399 = vector.broadcast %398 : f32 to vector<4x16xf32>
    %400 = arith.mulf %399, %377 : vector<4x16xf32>
    %401 = arith.addf %367, %400 : vector<4x16xf32>
    %c184 = arith.constant 184 : index
    %402 = memref.load %arg3[%c184] : memref<224xf32, #tpu.memory_space<smem>>
    %403 = vector.broadcast %402 : f32 to vector<4x16xf32>
    %404 = arith.mulf %403, %377 : vector<4x16xf32>
    %405 = arith.addf %371, %404 : vector<4x16xf32>
    %c188 = arith.constant 188 : index
    %406 = memref.load %arg3[%c188] : memref<224xf32, #tpu.memory_space<smem>>
    %407 = vector.broadcast %406 : f32 to vector<4x16xf32>
    %408 = arith.mulf %407, %377 : vector<4x16xf32>
    %409 = arith.addf %375, %408 : vector<4x16xf32>
    %c0_82 = arith.constant 0 : index
    %c1_83 = arith.constant 1 : index
    %c10_84 = arith.constant 10 : index
    %c0_85 = arith.constant 0 : index
    %410 = vector.load %arg2[%c0_82, %c1_83, %c10_84, %c0_85] : memref<1x4x16x16xf32, #tpu.memory_space<vmem>>, vector<1x1x4x16xf32>
    %411 = vector.shape_cast %410 : vector<1x1x4x16xf32> to vector<4x16xf32>
    %c161 = arith.constant 161 : index
    %412 = memref.load %arg3[%c161] : memref<224xf32, #tpu.memory_space<smem>>
    %413 = vector.broadcast %412 : f32 to vector<4x16xf32>
    %414 = arith.mulf %413, %411 : vector<4x16xf32>
    %415 = arith.addf %381, %414 : vector<4x16xf32>
    %c165 = arith.constant 165 : index
    %416 = memref.load %arg3[%c165] : memref<224xf32, #tpu.memory_space<smem>>
    %417 = vector.broadcast %416 : f32 to vector<4x16xf32>
    %418 = arith.mulf %417, %411 : vector<4x16xf32>
    %419 = arith.addf %385, %418 : vector<4x16xf32>
    %c169 = arith.constant 169 : index
    %420 = memref.load %arg3[%c169] : memref<224xf32, #tpu.memory_space<smem>>
    %421 = vector.broadcast %420 : f32 to vector<4x16xf32>
    %422 = arith.mulf %421, %411 : vector<4x16xf32>
    %423 = arith.addf %389, %422 : vector<4x16xf32>
    %c173 = arith.constant 173 : index
    %424 = memref.load %arg3[%c173] : memref<224xf32, #tpu.memory_space<smem>>
    %425 = vector.broadcast %424 : f32 to vector<4x16xf32>
    %426 = arith.mulf %425, %411 : vector<4x16xf32>
    %427 = arith.addf %393, %426 : vector<4x16xf32>
    %c177 = arith.constant 177 : index
    %428 = memref.load %arg3[%c177] : memref<224xf32, #tpu.memory_space<smem>>
    %429 = vector.broadcast %428 : f32 to vector<4x16xf32>
    %430 = arith.mulf %429, %411 : vector<4x16xf32>
    %431 = arith.addf %397, %430 : vector<4x16xf32>
    %c181 = arith.constant 181 : index
    %432 = memref.load %arg3[%c181] : memref<224xf32, #tpu.memory_space<smem>>
    %433 = vector.broadcast %432 : f32 to vector<4x16xf32>
    %434 = arith.mulf %433, %411 : vector<4x16xf32>
    %435 = arith.addf %401, %434 : vector<4x16xf32>
    %c185 = arith.constant 185 : index
    %436 = memref.load %arg3[%c185] : memref<224xf32, #tpu.memory_space<smem>>
    %437 = vector.broadcast %436 : f32 to vector<4x16xf32>
    %438 = arith.mulf %437, %411 : vector<4x16xf32>
    %439 = arith.addf %405, %438 : vector<4x16xf32>
    %c189 = arith.constant 189 : index
    %440 = memref.load %arg3[%c189] : memref<224xf32, #tpu.memory_space<smem>>
    %441 = vector.broadcast %440 : f32 to vector<4x16xf32>
    %442 = arith.mulf %441, %411 : vector<4x16xf32>
    %443 = arith.addf %409, %442 : vector<4x16xf32>
    %c0_86 = arith.constant 0 : index
    %c2_87 = arith.constant 2 : index
    %c10_88 = arith.constant 10 : index
    %c0_89 = arith.constant 0 : index
    %444 = vector.load %arg2[%c0_86, %c2_87, %c10_88, %c0_89] : memref<1x4x16x16xf32, #tpu.memory_space<vmem>>, vector<1x1x4x16xf32>
    %445 = vector.shape_cast %444 : vector<1x1x4x16xf32> to vector<4x16xf32>
    %c162 = arith.constant 162 : index
    %446 = memref.load %arg3[%c162] : memref<224xf32, #tpu.memory_space<smem>>
    %447 = vector.broadcast %446 : f32 to vector<4x16xf32>
    %448 = arith.mulf %447, %445 : vector<4x16xf32>
    %449 = arith.addf %415, %448 : vector<4x16xf32>
    %c166 = arith.constant 166 : index
    %450 = memref.load %arg3[%c166] : memref<224xf32, #tpu.memory_space<smem>>
    %451 = vector.broadcast %450 : f32 to vector<4x16xf32>
    %452 = arith.mulf %451, %445 : vector<4x16xf32>
    %453 = arith.addf %419, %452 : vector<4x16xf32>
    %c170 = arith.constant 170 : index
    %454 = memref.load %arg3[%c170] : memref<224xf32, #tpu.memory_space<smem>>
    %455 = vector.broadcast %454 : f32 to vector<4x16xf32>
    %456 = arith.mulf %455, %445 : vector<4x16xf32>
    %457 = arith.addf %423, %456 : vector<4x16xf32>
    %c174 = arith.constant 174 : index
    %458 = memref.load %arg3[%c174] : memref<224xf32, #tpu.memory_space<smem>>
    %459 = vector.broadcast %458 : f32 to vector<4x16xf32>
    %460 = arith.mulf %459, %445 : vector<4x16xf32>
    %461 = arith.addf %427, %460 : vector<4x16xf32>
    %c178 = arith.constant 178 : index
    %462 = memref.load %arg3[%c178] : memref<224xf32, #tpu.memory_space<smem>>
    %463 = vector.broadcast %462 : f32 to vector<4x16xf32>
    %464 = arith.mulf %463, %445 : vector<4x16xf32>
    %465 = arith.addf %431, %464 : vector<4x16xf32>
    %c182 = arith.constant 182 : index
    %466 = memref.load %arg3[%c182] : memref<224xf32, #tpu.memory_space<smem>>
    %467 = vector.broadcast %466 : f32 to vector<4x16xf32>
    %468 = arith.mulf %467, %445 : vector<4x16xf32>
    %469 = arith.addf %435, %468 : vector<4x16xf32>
    %c186 = arith.constant 186 : index
    %470 = memref.load %arg3[%c186] : memref<224xf32, #tpu.memory_space<smem>>
    %471 = vector.broadcast %470 : f32 to vector<4x16xf32>
    %472 = arith.mulf %471, %445 : vector<4x16xf32>
    %473 = arith.addf %439, %472 : vector<4x16xf32>
    %c190 = arith.constant 190 : index
    %474 = memref.load %arg3[%c190] : memref<224xf32, #tpu.memory_space<smem>>
    %475 = vector.broadcast %474 : f32 to vector<4x16xf32>
    %476 = arith.mulf %475, %445 : vector<4x16xf32>
    %477 = arith.addf %443, %476 : vector<4x16xf32>
    %c0_90 = arith.constant 0 : index
    %c3_91 = arith.constant 3 : index
    %c10_92 = arith.constant 10 : index
    %c0_93 = arith.constant 0 : index
    %478 = vector.load %arg2[%c0_90, %c3_91, %c10_92, %c0_93] : memref<1x4x16x16xf32, #tpu.memory_space<vmem>>, vector<1x1x4x16xf32>
    %479 = vector.shape_cast %478 : vector<1x1x4x16xf32> to vector<4x16xf32>
    %c163 = arith.constant 163 : index
    %480 = memref.load %arg3[%c163] : memref<224xf32, #tpu.memory_space<smem>>
    %481 = vector.broadcast %480 : f32 to vector<4x16xf32>
    %482 = arith.mulf %481, %479 : vector<4x16xf32>
    %483 = arith.addf %449, %482 : vector<4x16xf32>
    %c167 = arith.constant 167 : index
    %484 = memref.load %arg3[%c167] : memref<224xf32, #tpu.memory_space<smem>>
    %485 = vector.broadcast %484 : f32 to vector<4x16xf32>
    %486 = arith.mulf %485, %479 : vector<4x16xf32>
    %487 = arith.addf %453, %486 : vector<4x16xf32>
    %c171 = arith.constant 171 : index
    %488 = memref.load %arg3[%c171] : memref<224xf32, #tpu.memory_space<smem>>
    %489 = vector.broadcast %488 : f32 to vector<4x16xf32>
    %490 = arith.mulf %489, %479 : vector<4x16xf32>
    %491 = arith.addf %457, %490 : vector<4x16xf32>
    %c175 = arith.constant 175 : index
    %492 = memref.load %arg3[%c175] : memref<224xf32, #tpu.memory_space<smem>>
    %493 = vector.broadcast %492 : f32 to vector<4x16xf32>
    %494 = arith.mulf %493, %479 : vector<4x16xf32>
    %495 = arith.addf %461, %494 : vector<4x16xf32>
    %c179 = arith.constant 179 : index
    %496 = memref.load %arg3[%c179] : memref<224xf32, #tpu.memory_space<smem>>
    %497 = vector.broadcast %496 : f32 to vector<4x16xf32>
    %498 = arith.mulf %497, %479 : vector<4x16xf32>
    %499 = arith.addf %465, %498 : vector<4x16xf32>
    %c183 = arith.constant 183 : index
    %500 = memref.load %arg3[%c183] : memref<224xf32, #tpu.memory_space<smem>>
    %501 = vector.broadcast %500 : f32 to vector<4x16xf32>
    %502 = arith.mulf %501, %479 : vector<4x16xf32>
    %503 = arith.addf %469, %502 : vector<4x16xf32>
    %c187 = arith.constant 187 : index
    %504 = memref.load %arg3[%c187] : memref<224xf32, #tpu.memory_space<smem>>
    %505 = vector.broadcast %504 : f32 to vector<4x16xf32>
    %506 = arith.mulf %505, %479 : vector<4x16xf32>
    %507 = arith.addf %473, %506 : vector<4x16xf32>
    %c191 = arith.constant 191 : index
    %508 = memref.load %arg3[%c191] : memref<224xf32, #tpu.memory_space<smem>>
    %509 = vector.broadcast %508 : f32 to vector<4x16xf32>
    %510 = arith.mulf %509, %479 : vector<4x16xf32>
    %511 = arith.addf %477, %510 : vector<4x16xf32>
    %c0_94 = arith.constant 0 : index
    %c0_95 = arith.constant 0 : index
    %c12 = arith.constant 12 : index
    %c0_96 = arith.constant 0 : index
    %512 = vector.load %arg2[%c0_94, %c0_95, %c12, %c0_96] : memref<1x4x16x16xf32, #tpu.memory_space<vmem>>, vector<1x1x4x16xf32>
    %513 = vector.shape_cast %512 : vector<1x1x4x16xf32> to vector<4x16xf32>
    %c192 = arith.constant 192 : index
    %514 = memref.load %arg3[%c192] : memref<224xf32, #tpu.memory_space<smem>>
    %515 = vector.broadcast %514 : f32 to vector<4x16xf32>
    %516 = arith.mulf %515, %513 : vector<4x16xf32>
    %517 = arith.addf %483, %516 : vector<4x16xf32>
    %c196 = arith.constant 196 : index
    %518 = memref.load %arg3[%c196] : memref<224xf32, #tpu.memory_space<smem>>
    %519 = vector.broadcast %518 : f32 to vector<4x16xf32>
    %520 = arith.mulf %519, %513 : vector<4x16xf32>
    %521 = arith.addf %487, %520 : vector<4x16xf32>
    %c200 = arith.constant 200 : index
    %522 = memref.load %arg3[%c200] : memref<224xf32, #tpu.memory_space<smem>>
    %523 = vector.broadcast %522 : f32 to vector<4x16xf32>
    %524 = arith.mulf %523, %513 : vector<4x16xf32>
    %525 = arith.addf %491, %524 : vector<4x16xf32>
    %c204 = arith.constant 204 : index
    %526 = memref.load %arg3[%c204] : memref<224xf32, #tpu.memory_space<smem>>
    %527 = vector.broadcast %526 : f32 to vector<4x16xf32>
    %528 = arith.mulf %527, %513 : vector<4x16xf32>
    %529 = arith.addf %495, %528 : vector<4x16xf32>
    %c208 = arith.constant 208 : index
    %530 = memref.load %arg3[%c208] : memref<224xf32, #tpu.memory_space<smem>>
    %531 = vector.broadcast %530 : f32 to vector<4x16xf32>
    %532 = arith.mulf %531, %513 : vector<4x16xf32>
    %533 = arith.addf %499, %532 : vector<4x16xf32>
    %c212 = arith.constant 212 : index
    %534 = memref.load %arg3[%c212] : memref<224xf32, #tpu.memory_space<smem>>
    %535 = vector.broadcast %534 : f32 to vector<4x16xf32>
    %536 = arith.mulf %535, %513 : vector<4x16xf32>
    %537 = arith.addf %503, %536 : vector<4x16xf32>
    %c216 = arith.constant 216 : index
    %538 = memref.load %arg3[%c216] : memref<224xf32, #tpu.memory_space<smem>>
    %539 = vector.broadcast %538 : f32 to vector<4x16xf32>
    %540 = arith.mulf %539, %513 : vector<4x16xf32>
    %541 = arith.addf %507, %540 : vector<4x16xf32>
    %c220 = arith.constant 220 : index
    %542 = memref.load %arg3[%c220] : memref<224xf32, #tpu.memory_space<smem>>
    %543 = vector.broadcast %542 : f32 to vector<4x16xf32>
    %544 = arith.mulf %543, %513 : vector<4x16xf32>
    %545 = arith.addf %511, %544 : vector<4x16xf32>
    %c0_97 = arith.constant 0 : index
    %c1_98 = arith.constant 1 : index
    %c12_99 = arith.constant 12 : index
    %c0_100 = arith.constant 0 : index
    %546 = vector.load %arg2[%c0_97, %c1_98, %c12_99, %c0_100] : memref<1x4x16x16xf32, #tpu.memory_space<vmem>>, vector<1x1x4x16xf32>
    %547 = vector.shape_cast %546 : vector<1x1x4x16xf32> to vector<4x16xf32>
    %c193 = arith.constant 193 : index
    %548 = memref.load %arg3[%c193] : memref<224xf32, #tpu.memory_space<smem>>
    %549 = vector.broadcast %548 : f32 to vector<4x16xf32>
    %550 = arith.mulf %549, %547 : vector<4x16xf32>
    %551 = arith.addf %517, %550 : vector<4x16xf32>
    %c197 = arith.constant 197 : index
    %552 = memref.load %arg3[%c197] : memref<224xf32, #tpu.memory_space<smem>>
    %553 = vector.broadcast %552 : f32 to vector<4x16xf32>
    %554 = arith.mulf %553, %547 : vector<4x16xf32>
    %555 = arith.addf %521, %554 : vector<4x16xf32>
    %c201 = arith.constant 201 : index
    %556 = memref.load %arg3[%c201] : memref<224xf32, #tpu.memory_space<smem>>
    %557 = vector.broadcast %556 : f32 to vector<4x16xf32>
    %558 = arith.mulf %557, %547 : vector<4x16xf32>
    %559 = arith.addf %525, %558 : vector<4x16xf32>
    %c205 = arith.constant 205 : index
    %560 = memref.load %arg3[%c205] : memref<224xf32, #tpu.memory_space<smem>>
    %561 = vector.broadcast %560 : f32 to vector<4x16xf32>
    %562 = arith.mulf %561, %547 : vector<4x16xf32>
    %563 = arith.addf %529, %562 : vector<4x16xf32>
    %c209 = arith.constant 209 : index
    %564 = memref.load %arg3[%c209] : memref<224xf32, #tpu.memory_space<smem>>
    %565 = vector.broadcast %564 : f32 to vector<4x16xf32>
    %566 = arith.mulf %565, %547 : vector<4x16xf32>
    %567 = arith.addf %533, %566 : vector<4x16xf32>
    %c213 = arith.constant 213 : index
    %568 = memref.load %arg3[%c213] : memref<224xf32, #tpu.memory_space<smem>>
    %569 = vector.broadcast %568 : f32 to vector<4x16xf32>
    %570 = arith.mulf %569, %547 : vector<4x16xf32>
    %571 = arith.addf %537, %570 : vector<4x16xf32>
    %c217 = arith.constant 217 : index
    %572 = memref.load %arg3[%c217] : memref<224xf32, #tpu.memory_space<smem>>
    %573 = vector.broadcast %572 : f32 to vector<4x16xf32>
    %574 = arith.mulf %573, %547 : vector<4x16xf32>
    %575 = arith.addf %541, %574 : vector<4x16xf32>
    %c221 = arith.constant 221 : index
    %576 = memref.load %arg3[%c221] : memref<224xf32, #tpu.memory_space<smem>>
    %577 = vector.broadcast %576 : f32 to vector<4x16xf32>
    %578 = arith.mulf %577, %547 : vector<4x16xf32>
    %579 = arith.addf %545, %578 : vector<4x16xf32>
    %c0_101 = arith.constant 0 : index
    %c2_102 = arith.constant 2 : index
    %c12_103 = arith.constant 12 : index
    %c0_104 = arith.constant 0 : index
    %580 = vector.load %arg2[%c0_101, %c2_102, %c12_103, %c0_104] : memref<1x4x16x16xf32, #tpu.memory_space<vmem>>, vector<1x1x4x16xf32>
    %581 = vector.shape_cast %580 : vector<1x1x4x16xf32> to vector<4x16xf32>
    %c194 = arith.constant 194 : index
    %582 = memref.load %arg3[%c194] : memref<224xf32, #tpu.memory_space<smem>>
    %583 = vector.broadcast %582 : f32 to vector<4x16xf32>
    %584 = arith.mulf %583, %581 : vector<4x16xf32>
    %585 = arith.addf %551, %584 : vector<4x16xf32>
    %c198 = arith.constant 198 : index
    %586 = memref.load %arg3[%c198] : memref<224xf32, #tpu.memory_space<smem>>
    %587 = vector.broadcast %586 : f32 to vector<4x16xf32>
    %588 = arith.mulf %587, %581 : vector<4x16xf32>
    %589 = arith.addf %555, %588 : vector<4x16xf32>
    %c202 = arith.constant 202 : index
    %590 = memref.load %arg3[%c202] : memref<224xf32, #tpu.memory_space<smem>>
    %591 = vector.broadcast %590 : f32 to vector<4x16xf32>
    %592 = arith.mulf %591, %581 : vector<4x16xf32>
    %593 = arith.addf %559, %592 : vector<4x16xf32>
    %c206 = arith.constant 206 : index
    %594 = memref.load %arg3[%c206] : memref<224xf32, #tpu.memory_space<smem>>
    %595 = vector.broadcast %594 : f32 to vector<4x16xf32>
    %596 = arith.mulf %595, %581 : vector<4x16xf32>
    %597 = arith.addf %563, %596 : vector<4x16xf32>
    %c210 = arith.constant 210 : index
    %598 = memref.load %arg3[%c210] : memref<224xf32, #tpu.memory_space<smem>>
    %599 = vector.broadcast %598 : f32 to vector<4x16xf32>
    %600 = arith.mulf %599, %581 : vector<4x16xf32>
    %601 = arith.addf %567, %600 : vector<4x16xf32>
    %c214 = arith.constant 214 : index
    %602 = memref.load %arg3[%c214] : memref<224xf32, #tpu.memory_space<smem>>
    %603 = vector.broadcast %602 : f32 to vector<4x16xf32>
    %604 = arith.mulf %603, %581 : vector<4x16xf32>
    %605 = arith.addf %571, %604 : vector<4x16xf32>
    %c218 = arith.constant 218 : index
    %606 = memref.load %arg3[%c218] : memref<224xf32, #tpu.memory_space<smem>>
    %607 = vector.broadcast %606 : f32 to vector<4x16xf32>
    %608 = arith.mulf %607, %581 : vector<4x16xf32>
    %609 = arith.addf %575, %608 : vector<4x16xf32>
    %c222 = arith.constant 222 : index
    %610 = memref.load %arg3[%c222] : memref<224xf32, #tpu.memory_space<smem>>
    %611 = vector.broadcast %610 : f32 to vector<4x16xf32>
    %612 = arith.mulf %611, %581 : vector<4x16xf32>
    %613 = arith.addf %579, %612 : vector<4x16xf32>
    %c0_105 = arith.constant 0 : index
    %c3_106 = arith.constant 3 : index
    %c12_107 = arith.constant 12 : index
    %c0_108 = arith.constant 0 : index
    %614 = vector.load %arg2[%c0_105, %c3_106, %c12_107, %c0_108] : memref<1x4x16x16xf32, #tpu.memory_space<vmem>>, vector<1x1x4x16xf32>
    %615 = vector.shape_cast %614 : vector<1x1x4x16xf32> to vector<4x16xf32>
    %c195 = arith.constant 195 : index
    %616 = memref.load %arg3[%c195] : memref<224xf32, #tpu.memory_space<smem>>
    %617 = vector.broadcast %616 : f32 to vector<4x16xf32>
    %618 = arith.mulf %617, %615 : vector<4x16xf32>
    %619 = arith.addf %585, %618 : vector<4x16xf32>
    %c199 = arith.constant 199 : index
    %620 = memref.load %arg3[%c199] : memref<224xf32, #tpu.memory_space<smem>>
    %621 = vector.broadcast %620 : f32 to vector<4x16xf32>
    %622 = arith.mulf %621, %615 : vector<4x16xf32>
    %623 = arith.addf %589, %622 : vector<4x16xf32>
    %c203 = arith.constant 203 : index
    %624 = memref.load %arg3[%c203] : memref<224xf32, #tpu.memory_space<smem>>
    %625 = vector.broadcast %624 : f32 to vector<4x16xf32>
    %626 = arith.mulf %625, %615 : vector<4x16xf32>
    %627 = arith.addf %593, %626 : vector<4x16xf32>
    %c207 = arith.constant 207 : index
    %628 = memref.load %arg3[%c207] : memref<224xf32, #tpu.memory_space<smem>>
    %629 = vector.broadcast %628 : f32 to vector<4x16xf32>
    %630 = arith.mulf %629, %615 : vector<4x16xf32>
    %631 = arith.addf %597, %630 : vector<4x16xf32>
    %c211 = arith.constant 211 : index
    %632 = memref.load %arg3[%c211] : memref<224xf32, #tpu.memory_space<smem>>
    %633 = vector.broadcast %632 : f32 to vector<4x16xf32>
    %634 = arith.mulf %633, %615 : vector<4x16xf32>
    %635 = arith.addf %601, %634 : vector<4x16xf32>
    %c215 = arith.constant 215 : index
    %636 = memref.load %arg3[%c215] : memref<224xf32, #tpu.memory_space<smem>>
    %637 = vector.broadcast %636 : f32 to vector<4x16xf32>
    %638 = arith.mulf %637, %615 : vector<4x16xf32>
    %639 = arith.addf %605, %638 : vector<4x16xf32>
    %c219 = arith.constant 219 : index
    %640 = memref.load %arg3[%c219] : memref<224xf32, #tpu.memory_space<smem>>
    %641 = vector.broadcast %640 : f32 to vector<4x16xf32>
    %642 = arith.mulf %641, %615 : vector<4x16xf32>
    %643 = arith.addf %609, %642 : vector<4x16xf32>
    %c223 = arith.constant 223 : index
    %644 = memref.load %arg3[%c223] : memref<224xf32, #tpu.memory_space<smem>>
    %645 = vector.broadcast %644 : f32 to vector<4x16xf32>
    %646 = arith.mulf %645, %615 : vector<4x16xf32>
    %647 = arith.addf %613, %646 : vector<4x16xf32>
    %c0_109 = arith.constant 0 : index
    %c0_110 = arith.constant 0 : index
    %c0_111 = arith.constant 0 : index
    %c0_112 = arith.constant 0 : index
    %648 = vector.load %arg5[%c0_109, %c0_110, %c0_111, %c0_112] : memref<1x8x4x16xf32, #tpu.memory_space<vmem>>, vector<1x1x4x16xf32>
    %649 = vector.shape_cast %648 : vector<1x1x4x16xf32> to vector<4x16xf32>
    %650 = vector.shape_cast %619 : vector<4x16xf32> to vector<1x1x4x16xf32>
    tpu.vector_store %arg5[%c0_109, %c0_110, %c0_111, %c0_112], %650 {strides = array<i32>} : memref<1x8x4x16xf32, #tpu.memory_space<vmem>>, vector<1x1x4x16xf32>,
    %c0_113 = arith.constant 0 : index
    %c1_114 = arith.constant 1 : index
    %c0_115 = arith.constant 0 : index
    %c0_116 = arith.constant 0 : index
    %651 = vector.load %arg5[%c0_113, %c1_114, %c0_115, %c0_116] : memref<1x8x4x16xf32, #tpu.memory_space<vmem>>, vector<1x1x4x16xf32>
    %652 = vector.shape_cast %651 : vector<1x1x4x16xf32> to vector<4x16xf32>
    %653 = vector.shape_cast %623 : vector<4x16xf32> to vector<1x1x4x16xf32>
    tpu.vector_store %arg5[%c0_113, %c1_114, %c0_115, %c0_116], %653 {strides = array<i32>} : memref<1x8x4x16xf32, #tpu.memory_space<vmem>>, vector<1x1x4x16xf32>,
    %c0_117 = arith.constant 0 : index
    %c2_118 = arith.constant 2 : index
    %c0_119 = arith.constant 0 : index
    %c0_120 = arith.constant 0 : index
    %654 = vector.load %arg5[%c0_117, %c2_118, %c0_119, %c0_120] : memref<1x8x4x16xf32, #tpu.memory_space<vmem>>, vector<1x1x4x16xf32>
    %655 = vector.shape_cast %654 : vector<1x1x4x16xf32> to vector<4x16xf32>
    %656 = vector.shape_cast %627 : vector<4x16xf32> to vector<1x1x4x16xf32>
    tpu.vector_store %arg5[%c0_117, %c2_118, %c0_119, %c0_120], %656 {strides = array<i32>} : memref<1x8x4x16xf32, #tpu.memory_space<vmem>>, vector<1x1x4x16xf32>,
    %c0_121 = arith.constant 0 : index
    %c3_122 = arith.constant 3 : index
    %c0_123 = arith.constant 0 : index
    %c0_124 = arith.constant 0 : index
    %657 = vector.load %arg5[%c0_121, %c3_122, %c0_123, %c0_124] : memref<1x8x4x16xf32, #tpu.memory_space<vmem>>, vector<1x1x4x16xf32>
    %658 = vector.shape_cast %657 : vector<1x1x4x16xf32> to vector<4x16xf32>
    %659 = vector.shape_cast %631 : vector<4x16xf32> to vector<1x1x4x16xf32>
    tpu.vector_store %arg5[%c0_121, %c3_122, %c0_123, %c0_124], %659 {strides = array<i32>} : memref<1x8x4x16xf32, #tpu.memory_space<vmem>>, vector<1x1x4x16xf32>,
    %c0_125 = arith.constant 0 : index
    %c4_126 = arith.constant 4 : index
    %c0_127 = arith.constant 0 : index
    %c0_128 = arith.constant 0 : index
    %660 = vector.load %arg5[%c0_125, %c4_126, %c0_127, %c0_128] : memref<1x8x4x16xf32, #tpu.memory_space<vmem>>, vector<1x1x4x16xf32>
    %661 = vector.shape_cast %660 : vector<1x1x4x16xf32> to vector<4x16xf32>
    %662 = vector.shape_cast %635 : vector<4x16xf32> to vector<1x1x4x16xf32>
    tpu.vector_store %arg5[%c0_125, %c4_126, %c0_127, %c0_128], %662 {strides = array<i32>} : memref<1x8x4x16xf32, #tpu.memory_space<vmem>>, vector<1x1x4x16xf32>,
    %c0_129 = arith.constant 0 : index
    %c5_130 = arith.constant 5 : index
    %c0_131 = arith.constant 0 : index
    %c0_132 = arith.constant 0 : index
    %663 = vector.load %arg5[%c0_129, %c5_130, %c0_131, %c0_132] : memref<1x8x4x16xf32, #tpu.memory_space<vmem>>, vector<1x1x4x16xf32>
    %664 = vector.shape_cast %663 : vector<1x1x4x16xf32> to vector<4x16xf32>
    %665 = vector.shape_cast %639 : vector<4x16xf32> to vector<1x1x4x16xf32>
    tpu.vector_store %arg5[%c0_129, %c5_130, %c0_131, %c0_132], %665 {strides = array<i32>} : memref<1x8x4x16xf32, #tpu.memory_space<vmem>>, vector<1x1x4x16xf32>,
    %c0_133 = arith.constant 0 : index
    %c6_134 = arith.constant 6 : index
    %c0_135 = arith.constant 0 : index
    %c0_136 = arith.constant 0 : index
    %666 = vector.load %arg5[%c0_133, %c6_134, %c0_135, %c0_136] : memref<1x8x4x16xf32, #tpu.memory_space<vmem>>, vector<1x1x4x16xf32>
    %667 = vector.shape_cast %666 : vector<1x1x4x16xf32> to vector<4x16xf32>
    %668 = vector.shape_cast %643 : vector<4x16xf32> to vector<1x1x4x16xf32>
    tpu.vector_store %arg5[%c0_133, %c6_134, %c0_135, %c0_136], %668 {strides = array<i32>} : memref<1x8x4x16xf32, #tpu.memory_space<vmem>>, vector<1x1x4x16xf32>,
    %c0_137 = arith.constant 0 : index
    %c7_138 = arith.constant 7 : index
    %c0_139 = arith.constant 0 : index
    %c0_140 = arith.constant 0 : index
    %669 = vector.load %arg5[%c0_137, %c7_138, %c0_139, %c0_140] : memref<1x8x4x16xf32, #tpu.memory_space<vmem>>, vector<1x1x4x16xf32>
    %670 = vector.shape_cast %669 : vector<1x1x4x16xf32> to vector<4x16xf32>
    %671 = vector.shape_cast %647 : vector<4x16xf32> to vector<1x1x4x16xf32>
    tpu.vector_store %arg5[%c0_137, %c7_138, %c0_139, %c0_140], %671 {strides = array<i32>} : memref<1x8x4x16xf32, #tpu.memory_space<vmem>>, vector<1x1x4x16xf32>,
    return
  }
  func.func @transform_0(%arg0: i32, %arg1: i32) -> (i32, i32, i32, i32) {
    %c0_i32 = arith.constant 0 : i32
    %c0_i32_0 = arith.constant 0 : i32
    %c0_i32_1 = arith.constant 0 : i32
    return %arg0, %c0_i32, %c0_i32_0, %arg1 : i32, i32, i32, i32
  }
  func.func @transform_1(%arg0: i32, %arg1: i32) -> i32 {
    %c0_i32 = arith.constant 0 : i32
    %c0_i32_0 = arith.constant 0 : i32
    return %c0_i32 : i32
  }
  func.func @transform_2(%arg0: i32, %arg1: i32) -> i32 {
    %c0_i32 = arith.constant 0 : i32
    %c0_i32_0 = arith.constant 0 : i32
    return %c0_i32 : i32
  }
  func.func @transform_3(%arg0: i32, %arg1: i32) -> (i32, i32, i32, i32) {
    %c0_i32 = arith.constant 0 : i32
    %c0_i32_0 = arith.constant 0 : i32
    %c0_i32_1 = arith.constant 0 : i32
    return %arg0, %c0_i32, %c0_i32_0, %arg1 : i32, i32, i32, i32
  }
}

</mosaic_0001>

<bundles_post_ra>
// kernel: tpu_custom_call.1
= control target key start
LH: loop header
LB: loop body
LE: loop exit
PB: predicated region body
PF: predicated region fallthrough
CT: control target
= control target key end

     0   :  { %s2124_s0 = inlined_call_operand.hbm [shape: f32[2,4,16,16], index: 0, kind: input, shape index: {}]   ;;  %s2125_s1 = inlined_call_operand.hbm [shape: f32[224], index: 1, kind: input, shape index: {}]   ;;  %s2126_s2 = inlined_call_operand.vmem [shape: f32[8], index: 2, kind: input, shape index: {}]   ;;  %s2127_s3 = inlined_call_operand.hbm [shape: f32[2,8,4,16], index: 3, kind: output, shape index: {}]  }
   0x1   :  { %2142 = sst [smem:[#allocation27_spill]] %s2124_s0 }
   0x2   :  { %2143 = sst [smem:[#allocation28_spill]] %s2125_s1 }
   0x3   :  { %2144 = sst [smem:[#allocation29_spill]] %s2126_s2 }
   0x4   :  { %2145 = sst [smem:[#allocation30_spill]] %s2127_s3 }
   0x5   :  { %8 = vsyncpa [#allocation3], 0 }
   0x6   :  { %10 = vsyncpa [#allocation3 + $0x1], 0 }
   0x7   :  { %11 = vsyncpa [#allocation5], 0 }
   0x8   :  { %12 = vsyncpa [#allocation6], 0 }
   0x9   :  { %13 = vsyncpa [#allocation4], 0 }
   0xa   :  { %15 = vsyncpa [#allocation4 + $0x1], 0  ;;  %s1453_s12 = smov 0   ;;  %s1455_s13 = smov 0  }
   0xb   :  { %s1457_s14 = smov 0   ;;  %s1459_s15 = smov 0  }
   0xc   :  { %s1461_s16 = smov 0   ;;  %s1463_s17 = smov 0  }
   0xd LB: > { %2146 = sst [smem:[#allocation14_spill]] %s1403_s12  ;;  %s994_s18 = sadd.s32 4294967295, %s1423_s17   ;;  %s1423_s17 = sphi %s1463_s17, %s21_s17   ;;  %s1419_s16 = sphi %s1461_s16, %s2186_s16   ;;  %s1415_s15 = sphi %s1459_s15, %s2185_s15   ;;  %s1411_s14 = sphi %s1457_s14, %s2184_s14   ;;  %s1407_s13 = sphi %s1455_s13, %s2183_s13   ;;  %s1403_s12 = sphi %s1453_s12, %s2182_s12  }
   0xe   : > { %2147 = sst [smem:[#allocation15_spill]] %s1407_s13  ;;  %s995_s19 = sadd.s32 4294967294, %s1423_s17  }
   0xf   : > { %2148 = sst [smem:[#allocation16_spill]] %s1411_s14  ;;  %s42_s20 = sadd.s32 1, %s1411_s14 }
  0x10   : > { %2149 = sst [smem:[#allocation17_spill]] %s1415_s15  ;;  %p49_p0 = scmp.ne.s32.totalorder %s1411_s14, %s1407_s13 }
  0x11   : > { %2150 = sst [smem:[#allocation18_spill]] %s1419_s16  ;;  %p50_p1 = scmp.eq.s32.totalorder %s1423_s17, 0 }
  0x12   : > { %2151 = sst [smem:[#allocation19_spill]] %s1423_s17  ;;  %p55_p2 = scmp.ne.s32.totalorder %s1407_s13, %s1403_s12 }
  0x13   : > { %p1491_p3 = scmp.eq.s32.totalorder %s994_s18, 0  ;;  %p123_p4 = scmp.eq.s32.totalorder %s994_s18, 1 }
  0x14   : > { %p51_p5 = por %p50_p1, %p49_p0  ;;  %p129_p6 = scmp.eq.s32.totalorder %s995_s19, 1 }
  0x15   : > { %p1497_p7 = por %p1491_p3, %p55_p2  ;;  %p1501_p8 = por %p123_p4, %p49_p0 }
  0x16   : > { %p1505_p9 = por %p129_p6, %p55_p2  ;;  %p996_p10 = scmp.ge.s32.totalorder %s1423_s17, 1 }
  0x17   : > { %s2154_s23 = scalar_select %p1501_p8, 1, 0 }
  0x18   : > { %s2156_s24 = scalar_select %p1505_p9, 1, 0 }
  0x19   : > { %2155 = sst [smem:[#allocation20_spill]] %s2154_s23  ;;  %p136_p11 = scmp.lt.s32.totalorder %s1423_s17, 3 }
  0x1a   : > { %2157 = sst [smem:[#allocation21_spill]] %s2156_s24  ;;  %p1223_p1 = scmp.lt.s32.totalorder %s1423_s17, 2 }
  0x1b   : > { %p1512_p13 = pnand %p996_p10, %p136_p11  ;;  %s2159_s2 = sld [smem:[#allocation29_spill]] }
  0x1c   : > { %p1522_p4 = pnand %p1223_p1, %p51_p5  ;;  %s169_s4 = sand.u32 1, %s1411_s14  }
  0x1d   : > { %p1206_p0 = pneg %p1512_p13  ;;  %s33_s5 = sadd.s32 1, %s1419_s16 }
  0x1e   : > { %s1425_s6 = smov [#allocation7]   ;;  %s2162_s1 = sld [smem:[#allocation28_spill]] }
  0x1f   : > { %p1528_p2 = pnand %p1206_p0, %p1491_p3 }
  0x21   : > { %s158_s28 = sshll.u32 %s2159_s2, 4  ;;  %p1294_p6 = pneg %p1528_p2  ;;  %s159_s28 = int_to_ptr.vmem [resolvable:$true] %s158_s28 }
  0x22   : > { %s1292_s9 = scalar_lea.vmem %s159_s28, 16  ;;  %p1300_p1 = scmp.lt.s32.totalorder %s159_s28, %s159_s28 }
  0x23   : > { %p1293_p5 = scmp.ne.s32.totalorder %s159_s28, %s1292_s9  ;;  %p1301_p0 = scmp.lt.s32.totalorder %s1292_s9, %s1292_s9 }
  0x24   : > { %1209 = dma.hbm_to_smem (!%p1528_p2), %s2162_s1, 32, %s1425_s6, [#allocation5]  }
  0x25   : > { %p1295_p10 = pnand %p1294_p6, %p1293_p5  ;;  %p1302_p12 = por %p1301_p0, %p1300_p1 }
  0x27   : > { %p1296_p11 = pneg %p1295_p10 }
  0x29   : > { %p1303_p9 = pnand %p1302_p12, %p1296_p11 }
  0x2b   : > { %1306 = shalt.err (!%p1303_p9)
}
  0x2c   : > { %s1426_s10 = smov [#allocation8]   ;;  %p35_p8 = scmp.ge.s32.totalorder %s33_s5, 2 }
  0x2d   : > { %1212 = dma.vmem_to_smem (!%p1528_p2), %s159_s28, 16, %s1426_s10, [#allocation6]  }
  0x2e   : > { %s1000_s11 = sshll.u32 %s169_s4, 6  ;;  %s1192_s18 = sshll.u32 %s1419_s16, 10 }
  0x2f   : > { %s2188_s5 = smov (%p35_p8, %s33_s5), 0  ;;  %s2164_s0 = sld [smem:[#allocation27_spill]] }
  0x30   : > { %2163 = sst [smem:[#allocation22_spill]] %s2188_s5  ;;  %s37_s6 = ssub.s32 %s1419_s16, %s2188_s5 }
  0x31   : > { %s173_s7 = scalar_lea.vmem [#allocation2], %s1000_s11  ;;  %p40_p9 = scmp.eq.s32.totalorder %s37_s6, 0 }
  0x32   : > { %s181_s8 = sshll.u32 %s173_s7, 4  ;;  %s170_s9 = scalar_lea.sflag [#allocation3], %s169_s4  ;;  %s182_s8 = int_to_ptr.vmem [resolvable:$true] %s181_s8 }
  0x33   : > { %s1554_s30 = scalar_select %p40_p9, %s1411_s14, %s42_s20  }
  0x34   : > { %p1309_p12 = pneg %p1522_p4  ;;  %s1320_s28 = scalar_lea.vmem %s182_s8, 1024 }
  0x35   : > { %s180_s27 = scalar_lea.hbm %s2164_s0, %s1192_s18  ;;  %2165 = sst [smem:[#allocation23_spill]] %s1554_s30 }
  0x36   : > { %p1321_p2 = scmp.ne.s32.totalorder %s182_s8, %s1320_s28  ;;  %s1427_s10 = smov [#allocation2]  }
  0x37   : > { %s1325_s1 = sshll.u32 %s1427_s10, 4  ;;  %s1326_s1 = int_to_ptr.vmem [resolvable:$false] %s1325_s1 }
  0x38   : > { %p1323_p8 = pnand %p1321_p2, %p1309_p12  ;;  %s1327_s19 = scalar_lea.vmem %s1326_s1, 2048 }
  0x39   : > { %p1328_p6 = scmp.lt.s32.totalorder %s182_s8, %s1326_s1  ;;  %p1329_p10 = scmp.lt.s32.totalorder %s1327_s19, %s1320_s28 }
  0x3a   : > { %p1324_p5 = pneg %p1323_p8 }
  0x3b   : > { %p1330_p11 = por %p1329_p10, %p1328_p6 }
  0x3d   : > { %p1331_p1 = pnand %p1330_p11, %p1324_p5 }
  0x3f   : > { %1334 = shalt.err (!%p1331_p1)
}
  0x40   : > { %s1428_s11 = smov 128   ;;  %s1429_s20 = smov 8  }
  0x41   : > { %1216 = dma.hbm_to_vmem [thread:$0]  (!%p1522_p4), %s180_s27, 1024, %s182_s8, %s170_s9, %s1428_s11, %s1428_s11, %s1429_s20  }
  0x42   : > { %193 = sbr.rel (%p1512_p13) target bundleno = 266 (0x10a), region = 32 }
  0x47   : > { %s1563_s4 = sand.u32 1, %s1407_s13  }
  0x48   : > { %2166 = sst [smem:[#allocation24_spill]] %s1563_s4  ;;  %s1004_s18 = sshll.u32 %s1563_s4, 6 }
  0x49   : > { %s196_s1 = scalar_lea.sflag [#allocation3], %s1563_s4  ;;  %s1567_s26 = scalar_lea.vmem [#allocation2], %s1004_s18 }
  0x4a   : > { %1386 = dma.done.wait (%p1497_p7), %s196_s1, 1024  }
  0x4b   : > { %1388 = vsyncadd (%p1497_p7), %s196_s1, 4294966272 }
  0x4c   : > { %1390 = dma.done.wait (%p1491_p3), [#allocation5], 32  }
  0x4d   : > { %1392 = vsyncadd (%p1491_p3), [#allocation5], 4294967264 }
  0x4e   : > { %1394 = dma.done.wait (%p1491_p3), [#allocation6], 16  }
  0x4f   : > { %1396 = vsyncadd (%p1491_p3), [#allocation6], 4294967280 }
  0x50   : > { %212 = sfence }
  0x51   : > { %s1581_s25 = sld [smem:[#allocation8]]  ;;  %v247_v0 = vld [vmem:[%s1567_s26] sm:$0xf]  ;;  %v1017_v6 = vld [vmem:[%s1567_s26 + $0x10] sm:$0xf]  ;;  %vm854_vm0 = vcmask 125952  }
  0x52   : > { %s1583_s29 = sld [smem:[#allocation8 + $0x1]]  ;;  %v1020_v14 = vld [vmem:[%s1567_s26 + $0x20] sm:$0xf]  ;;  %v1023_v21 = vld [vmem:[%s1567_s26 + $0x30] sm:$0xf] }
  0x53   : > { %s1585_s27 = sld [smem:[#allocation8 + $0x2]]  ;;  %v286_v26 = vld [vmem:[%s1567_s26 + $0x2] sm:$0xf]  ;;  %v1030_v39 = vld [vmem:[%s1567_s26 + $0x12] sm:$0xf] }
  0x54   : > { %s1587_s22 = sld [smem:[#allocation8 + $0x3]]  ;;  %v1035_v52 = vld [vmem:[%s1567_s26 + $0x22] sm:$0xf] }
  0x55   : > { %s1589_s6 = sld [smem:[#allocation8 + $0x4]] }
  0x56   : > { %s1591_s7 = sld [smem:[#allocation8 + $0x5]] }
  0x57   : > { %2167 = sst [smem:[#allocation25_spill]] %s1581_s25 }
  0x58   : > { %2168 = sst [smem:[#allocation26_spill]] %s1583_s29 }
  0x59   : > { %s1593_s8 = sld [smem:[#allocation8 + $0x6]] }
  0x5a   : > { %s1595_s9 = sld [smem:[#allocation8 + $0x7]] }
  0x5b   : > { %s1015_s28 = sld [smem:[#allocation7 + $0x18]]  ;;  %v240_v33 = vstv %s1589_s6 }
  0x5c   : > { %s1016_s21 = sld [smem:[#allocation7 + $0x1c]]  ;;  %v242_v34 = vstv %s1591_s7 }
  0x5d   : > { %s1597_s10 = sld [smem:[#allocation7 + $0x19]] }
  0x5e   : > { %s1599_s19 = sld [smem:[#allocation7 + $0x1d]] }
  0x5f   : > { %s1601_s11 = sld [smem:[#allocation7 + $0x1a]]  ;;  %v244_v4 = vstv %s1593_s8 }
  0x60   : > { %s1603_s20 = sld [smem:[#allocation7 + $0x1e]]  ;;  %v246_v8 = vstv %s1595_s9 }
  0x61   : > { %s1605_s18 = sld [smem:[#allocation7 + $0x1b]]  ;;  %v249_v1 = vstv %s1015_s28 }
  0x62   : > { %s1607_s1 = sld [smem:[#allocation7 + $0x1f]]  ;;  %v253_v2 = vstv %s1016_s21  ;;  %v250_v3 = vmul.f32 %v249_v1, %v247_v0  ;;  %v1040_v1 = vld [vmem:[%s1567_s26 + $0x32] sm:$0xf] }
  0x63   : > { %s1609_s0 = sld [smem:[#allocation7 + $0x30]]  ;;  %v254_v5 = vmul.f32 %v253_v2, %v247_v0  ;;  %v259_v7 = vstv %s1597_s10 }
  0x64   : > { %s1611_s2 = sld [smem:[#allocation7 + $0x34]]  ;;  %v263_v9 = vstv %s1599_s19  ;;  %v251_v10 = vadd.f32 %v250_v3, %v244_v4  ;;  %v260_v11 = vmul.f32 %v1017_v6, %v259_v7 }
  0x65   : > { %s1613_s5 = sld [smem:[#allocation7 + $0x38]]  ;;  %v255_v12 = vadd.f32 %v254_v5, %v246_v8  ;;  %v264_v13 = vmul.f32 %v1017_v6, %v263_v9  ;;  %v269_v15 = vstv %s1601_s11 }
  0x66   : > { %s1615_s16 = sld [smem:[#allocation7 + $0x3c]]  ;;  %v273_v16 = vstv %s1603_s20  ;;  %v261_v17 = vadd.f32 %v260_v11, %v251_v10  ;;  %v270_v18 = vmul.f32 %v1020_v14, %v269_v15 }
  0x67   : > { %s1617_s30 = sld [smem:[#allocation7 + $0x31]]  ;;  %v265_v19 = vadd.f32 %v264_v13, %v255_v12  ;;  %v274_v20 = vmul.f32 %v1020_v14, %v273_v16  ;;  %v279_v22 = vstv %s1605_s18  ;;  %v354_v14 = vld [vmem:[%s1567_s26 + $0x4] sm:$0xf] }
  0x68   : > { %s1619_s14 = sld [smem:[#allocation7 + $0x35]]  ;;  %v283_v23 = vstv %s1607_s1  ;;  %v271_v24 = vadd.f32 %v270_v18, %v261_v17  ;;  %v280_v25 = vmul.f32 %v1023_v21, %v279_v22 }
  0x69   : > { %s1621_s13 = sld [smem:[#allocation7 + $0x39]]  ;;  %v288_v27 = vstv %s1609_s0  ;;  %v275_v29 = vadd.f32 %v274_v20, %v265_v19  ;;  %v284_v30 = vmul.f32 %v1023_v21, %v283_v23 }
  0x6a   : > { %s1623_s17 = sld [smem:[#allocation7 + $0x3d]]  ;;  %v292_v28 = vstv %s1611_s2  ;;  %v289_v35 = vmul.f32 %v288_v27, %v286_v26  ;;  %v281_v37 = vadd.f32 %v280_v25, %v271_v24  ;;  %v1049_v27 = vld [vmem:[%s1567_s26 + $0x14] sm:$0xf] }
  0x6b   : > { %s1626_s24 = sld [smem:[#allocation7 + $0x32]]  ;;  %v296_v31 = vstv %s1613_s5  ;;  %v293_v36 = vmul.f32 %v292_v28, %v286_v26  ;;  %v285_v42 = vadd.f32 %v284_v30, %v275_v29 }
  0x6c   : > { %s1628_s12 = sld [smem:[#allocation7 + $0x36]]  ;;  %v300_v32 = vstv %s1615_s16  ;;  %v297_v38 = vmul.f32 %v296_v31, %v286_v26  ;;  %v290_v46 = vadd.f32 %v289_v35, %v240_v33 }
  0x6d   : > { %s1630_s3 = sld [smem:[#allocation7 + $0x3a]]  ;;  %v305_v40 = vstv %s1617_s30  ;;  %v301_v43 = vmul.f32 %v300_v32, %v286_v26  ;;  %v294_v47 = vadd.f32 %v293_v36, %v242_v34 }
  0x6e   : > { %s1632_s23 = sld [smem:[#allocation7 + $0x3e]]  ;;  %v309_v41 = vstv %s1619_s14  ;;  %v306_v48 = vmul.f32 %v1030_v39, %v305_v40  ;;  %v298_v50 = vadd.f32 %v297_v38, %v281_v37  ;;  %v1054_v40 = vld [vmem:[%s1567_s26 + $0x24] sm:$0xf] }
  0x6f   : > { %s1637_s15 = sld [smem:[#allocation7 + $0x33]]  ;;  %v313_v44 = vstv %s1621_s13  ;;  %v310_v49 = vmul.f32 %v1030_v39, %v309_v41  ;;  %v302_v55 = vadd.f32 %v301_v43, %v285_v42 }
  0x70   : > { %s1641_s28 = sld [smem:[#allocation7 + $0x37]]  ;;  %v317_v45 = vstv %s1623_s17  ;;  %v314_v51 = vmul.f32 %v1030_v39, %v313_v44  ;;  %v307_v59 = vadd.f32 %v306_v48, %v290_v46 }
  0x71   : > { %s1643_s21 = sld [smem:[#allocation7 + $0x3b]]  ;;  %v322_v53 = vstv %s1626_s24  ;;  %v318_v56 = vmul.f32 %v1030_v39, %v317_v45  ;;  %v311_v60 = vadd.f32 %v310_v49, %v294_v47 }
  0x72   : > { %s1645_s4 = sld [smem:[#allocation7 + $0x3f]]  ;;  %v326_v54 = vstv %s1628_s12  ;;  %v323_v61 = vmul.f32 %v1035_v52, %v322_v53  ;;  %v315_v63 = vadd.f32 %v314_v51, %v298_v50  ;;  %v1059_v53 = vld [vmem:[%s1567_s26 + $0x34] sm:$0xf] }
  0x73   : > { %s1649_s8 = sld [smem:[#allocation7 + $0x50]]  ;;  %v330_v57 = vstv %s1630_s3  ;;  %v327_v62 = vmul.f32 %v1035_v52, %v326_v54  ;;  %v319_v4 = vadd.f32 %v318_v56, %v302_v55 }
  0x74   : > { %s1652_s9 = sld [smem:[#allocation7 + $0x54]]  ;;  %v334_v58 = vstv %s1632_s23  ;;  %v331_v0 = vmul.f32 %v1035_v52, %v330_v57  ;;  %v324_v8 = vadd.f32 %v323_v61, %v307_v59 }
  0x75   : > { %s1654_s10 = sld [smem:[#allocation7 + $0x58]]  ;;  %v339_v2 = vstv %s1637_s15  ;;  %v335_v5 = vmul.f32 %v1035_v52, %v334_v58  ;;  %v328_v9 = vadd.f32 %v327_v62, %v311_v60 }
  0x76   : > { %s1656_s19 = sld [smem:[#allocation7 + $0x5c]]  ;;  %v343_v3 = vstv %s1641_s28  ;;  %v340_v10 = vmul.f32 %v1040_v1, %v339_v2  ;;  %v332_v12 = vadd.f32 %v331_v0, %v315_v63  ;;  %v422_v2 = vld [vmem:[%s1567_s26 + $0x6] sm:$0xf] }
  0x77   : > { %s1660_s11 = sld [smem:[#allocation7 + $0x51]]  ;;  %v347_v6 = vstv %s1643_s21  ;;  %v344_v11 = vmul.f32 %v1040_v1, %v343_v3  ;;  %v336_v17 = vadd.f32 %v335_v5, %v319_v4 }
  0x78   : > { %s1663_s20 = sld [smem:[#allocation7 + $0x55]]  ;;  %v351_v7 = vstv %s1645_s4  ;;  %v348_v13 = vmul.f32 %v1040_v1, %v347_v6  ;;  %v341_v21 = vadd.f32 %v340_v10, %v324_v8 }
  0x79   : > { %s1665_s29 = sld [smem:[#allocation7 + $0x59]]  ;;  %v356_v15 = vstv %s1649_s8  ;;  %v352_v18 = vmul.f32 %v1040_v1, %v351_v7  ;;  %v345_v22 = vadd.f32 %v344_v11, %v328_v9 }
  0x7a   : > { %s1670_s25 = sld [smem:[#allocation7 + $0x5d]]  ;;  %v360_v16 = vstv %s1652_s9  ;;  %v357_v23 = vmul.f32 %v356_v15, %v354_v14  ;;  %v349_v25 = vadd.f32 %v348_v13, %v332_v12  ;;  %v1068_v15 = vld [vmem:[%s1567_s26 + $0x16] sm:$0xf] }
  0x7b   : > { %s1673_s18 = sld [smem:[#allocation7 + $0x52]]  ;;  %v364_v19 = vstv %s1654_s10  ;;  %v361_v24 = vmul.f32 %v360_v16, %v354_v14  ;;  %v353_v30 = vadd.f32 %v352_v18, %v336_v17 }
  0x7c   : > { %s1676_s1 = sld [smem:[#allocation7 + $0x56]]  ;;  %v368_v20 = vstv %s1656_s19  ;;  %v365_v26 = vmul.f32 %v364_v19, %v354_v14  ;;  %v358_v34 = vadd.f32 %v357_v23, %v341_v21 }
  0x7d   : > { %s1680_s0 = sld [smem:[#allocation7 + $0x5a]]  ;;  %v373_v28 = vstv %s1660_s11  ;;  %v369_v31 = vmul.f32 %v368_v20, %v354_v14  ;;  %v362_v35 = vadd.f32 %v361_v24, %v345_v22 }
  0x7e   : > { %s1685_s2 = sld [smem:[#allocation7 + $0x5e]]  ;;  %v377_v29 = vstv %s1663_s20  ;;  %v374_v36 = vmul.f32 %v1049_v27, %v373_v28  ;;  %v366_v38 = vadd.f32 %v365_v26, %v349_v25  ;;  %v1073_v28 = vld [vmem:[%s1567_s26 + $0x26] sm:$0xf] }
  0x7f   : > { %s1688_s16 = sld [smem:[#allocation7 + $0x53]]  ;;  %v381_v32 = vstv %s1665_s29  ;;  %v378_v37 = vmul.f32 %v1049_v27, %v377_v29  ;;  %v370_v43 = vadd.f32 %v369_v31, %v353_v30 }
  0x80   : > { %s1691_s5 = sld [smem:[#allocation7 + $0x57]]  ;;  %v385_v33 = vstv %s1670_s25  ;;  %v382_v39 = vmul.f32 %v1049_v27, %v381_v32  ;;  %v375_v47 = vadd.f32 %v374_v36, %v358_v34 }
  0x81   : > { %s1693_s30 = sld [smem:[#allocation7 + $0x5b]]  ;;  %v390_v41 = vstv %s1673_s18  ;;  %v386_v44 = vmul.f32 %v1049_v27, %v385_v33  ;;  %v379_v48 = vadd.f32 %v378_v37, %v362_v35 }
  0x82   : > { %s1698_s13 = sld [smem:[#allocation7 + $0x5f]]  ;;  %v394_v42 = vstv %s1676_s1  ;;  %v391_v49 = vmul.f32 %v1054_v40, %v390_v41  ;;  %v383_v51 = vadd.f32 %v382_v39, %v366_v38 }
  0x83   : > { %s1701_s14 = sld [smem:[#allocation7 + $0x70]]  ;;  %v398_v45 = vstv %s1680_s0  ;;  %v395_v50 = vmul.f32 %v1054_v40, %v394_v42  ;;  %v387_v56 = vadd.f32 %v386_v44, %v370_v43 }
  0x84   : > { %s1704_s17 = sld [smem:[#allocation7 + $0x74]]  ;;  %v402_v46 = vstv %s1685_s2  ;;  %v399_v52 = vmul.f32 %v1054_v40, %v398_v45  ;;  %v392_v60 = vadd.f32 %v391_v49, %v375_v47 }
  0x85   : > { %s1706_s24 = sld [smem:[#allocation7 + $0x78]]  ;;  %v407_v54 = vstv %s1688_s16  ;;  %v403_v57 = vmul.f32 %v1054_v40, %v402_v46  ;;  %v396_v61 = vadd.f32 %v395_v50, %v379_v48  ;;  %v1078_v40 = vld [vmem:[%s1567_s26 + $0x36] sm:$0xf]  ;;  %v490_v50 = vld [vmem:[%s1567_s26 + $0x8] sm:$0xf] }
  0x86   : > { %s1711_s3 = sld [smem:[#allocation7 + $0x7c]]  ;;  %v411_v55 = vstv %s1691_s5  ;;  %v408_v62 = vmul.f32 %v1059_v53, %v407_v54  ;;  %v400_v0 = vadd.f32 %v399_v52, %v383_v51  ;;  %v236_v52 = vstv %s1585_s27 }
  0x87   : > { %s1714_s12 = sld [smem:[#allocation7 + $0x71]]  ;;  %v415_v58 = vstv %s1693_s30  ;;  %v412_v63 = vmul.f32 %v1059_v53, %v411_v55  ;;  %v404_v5 = vadd.f32 %v403_v57, %v387_v56 }
  0x88   : > { %s1717_s23 = sld [smem:[#allocation7 + $0x75]]  ;;  %v419_v59 = vstv %s1698_s13  ;;  %v416_v1 = vmul.f32 %v1059_v53, %v415_v58  ;;  %v409_v9 = vadd.f32 %v408_v62, %v392_v60 }
  0x89   : > { %s1719_s15 = sld [smem:[#allocation7 + $0x79]]  ;;  %v424_v3 = vstv %s1701_s14  ;;  %v420_v6 = vmul.f32 %v1059_v53, %v419_v59  ;;  %v413_v10 = vadd.f32 %v412_v63, %v396_v61 }
  0x8a   : > { %s1724_s6 = sld [smem:[#allocation7 + $0x7d]]  ;;  %v428_v4 = vstv %s1704_s17  ;;  %v425_v11 = vmul.f32 %v424_v3, %v422_v2  ;;  %v417_v13 = vadd.f32 %v416_v1, %v400_v0  ;;  %v238_v0 = vstv %s1587_s22 }
  0x8b   : > { %s1727_s4 = sld [smem:[#allocation7 + $0x72]]  ;;  %v432_v7 = vstv %s1706_s24  ;;  %v429_v12 = vmul.f32 %v428_v4, %v422_v2  ;;  %v421_v17 = vadd.f32 %v420_v6, %v404_v5  ;;  %v1089_v6 = vld [vmem:[%s1567_s26 + $0x18] sm:$0xf] }
  0x8c   : > { %s1730_s7 = sld [smem:[#allocation7 + $0x76]]  ;;  %v436_v8 = vstv %s1711_s3  ;;  %v433_v14 = vmul.f32 %v432_v7, %v422_v2  ;;  %v426_v22 = vadd.f32 %v425_v11, %v409_v9 }
  0x8d   : > { %s1732_s28 = sld [smem:[#allocation7 + $0x7a]]  ;;  %v441_v16 = vstv %s1714_s12  ;;  %v437_v18 = vmul.f32 %v436_v8, %v422_v2  ;;  %v430_v23 = vadd.f32 %v429_v12, %v413_v10 }
  0x8e   : > { %s1737_s21 = sld [smem:[#allocation7 + $0x7e]]  ;;  %v445_v19 = vstv %s1717_s23  ;;  %v442_v24 = vmul.f32 %v1068_v15, %v441_v16  ;;  %v434_v25 = vadd.f32 %v433_v14, %v417_v13 }
  0x8f   : > { %s1740_s8 = sld [smem:[#allocation7 + $0x73]]  ;;  %v449_v20 = vstv %s1719_s15  ;;  %v446_v26 = vmul.f32 %v1068_v15, %v445_v19  ;;  %v438_v30 = vadd.f32 %v437_v18, %v421_v17 }
  0x90   : > { %s1743_s9 = sld [smem:[#allocation7 + $0x77]]  ;;  %v453_v21 = vstv %s1724_s6  ;;  %v450_v27 = vmul.f32 %v1068_v15, %v449_v20  ;;  %v443_v35 = vadd.f32 %v442_v24, %v426_v22 }
  0x91   : > { %s1745_s10 = sld [smem:[#allocation7 + $0x7b]]  ;;  %v458_v29 = vstv %s1727_s4  ;;  %v454_v31 = vmul.f32 %v1068_v15, %v453_v21  ;;  %v447_v37 = vadd.f32 %v446_v26, %v430_v23  ;;  %v1096_v26 = vld [vmem:[%s1567_s26 + $0x28] sm:$0xf] }
  0x92   : > { %s1750_s29 = sld [smem:[#allocation7 + $0x7f]]  ;;  %v462_v32 = vstv %s1730_s7  ;;  %v459_v36 = vmul.f32 %v1073_v28, %v458_v29  ;;  %v451_v38 = vadd.f32 %v450_v27, %v434_v25 }
  0x93   : > { %s1753_s25 = sld [smem:[#allocation7 + $0x88]]  ;;  %v466_v33 = vstv %s1732_s28  ;;  %v463_v39 = vmul.f32 %v1073_v28, %v462_v32  ;;  %v455_v42 = vadd.f32 %v454_v31, %v438_v30 }
  0x94   : > { %s1756_s19 = sld [smem:[#allocation7 + $0x8c]]  ;;  %v470_v34 = vstv %s1737_s21  ;;  %v467_v43 = vmul.f32 %v1073_v28, %v466_v33  ;;  %v460_v47 = vadd.f32 %v459_v36, %v443_v35 }
  0x95   : > { %s1758_s11 = sld [smem:[#allocation7 + $0x90]]  ;;  %v475_v41 = vstv %s1740_s8  ;;  %v471_v44 = vmul.f32 %v1073_v28, %v470_v34  ;;  %v464_v53 = vadd.f32 %v463_v39, %v447_v37 }
  0x96   : > { %s1763_s20 = sld [smem:[#allocation7 + $0x94]]  ;;  %v479_v45 = vstv %s1743_s9  ;;  %v476_v48 = vmul.f32 %v1078_v40, %v475_v41  ;;  %v468_v56 = vadd.f32 %v467_v43, %v451_v38  ;;  %v1103_v43 = vld [vmem:[%s1567_s26 + $0x38] sm:$0xf] }
  0x97   : > { %s1766_s18 = sld [smem:[#allocation7 + $0x98]]  ;;  %v483_v46 = vstv %s1745_s10  ;;  %v480_v54 = vmul.f32 %v1078_v40, %v479_v45  ;;  %v472_v57 = vadd.f32 %v471_v44, %v455_v42 }
  0x98   : > { %s1769_s1 = sld [smem:[#allocation7 + $0x9c]]  ;;  %v487_v49 = vstv %s1750_s29  ;;  %v484_v58 = vmul.f32 %v1078_v40, %v483_v46  ;;  %v477_v1 = vadd.f32 %v476_v48, %v460_v47 }
  0x99   : > { %s1771_s0 = sld [smem:[#allocation7 + $0x89]]  ;;  %v492_v51 = vstv %s1753_s25  ;;  %v488_v60 = vmul.f32 %v1078_v40, %v487_v49  ;;  %v481_v4 = vadd.f32 %v480_v54, %v464_v53 }
  0x9a   : > { %s1776_s2 = sld [smem:[#allocation7 + $0x8d]]  ;;  %v496_v55 = vstv %s1756_s19  ;;  %v493_v61 = vmul.f32 %v492_v51, %v490_v50  ;;  %v485_v9 = vadd.f32 %v484_v58, %v468_v56 }
  0x9b   : > { %s1779_s16 = sld [smem:[#allocation7 + $0x91]]  ;;  %v500_v59 = vstv %s1758_s11  ;;  %v497_v2 = vmul.f32 %v496_v55, %v490_v50  ;;  %v489_v13 = vadd.f32 %v488_v60, %v472_v57 }
  0x9c   : > { %s1782_s5 = sld [smem:[#allocation7 + $0x95]]  ;;  %v504_v62 = vstv %s1763_s20  ;;  %v501_v5 = vmul.f32 %v500_v59, %v490_v50  ;;  %v494_v14 = vadd.f32 %v493_v61, %v236_v52 }
  0x9d   : > { %s1784_s30 = sld [smem:[#allocation7 + $0x99]]  ;;  %v508_v63 = vstv %s1766_s18  ;;  %v505_v10 = vmul.f32 %v504_v62, %v490_v50  ;;  %v498_v16 = vadd.f32 %v497_v2, %v238_v0 }
  0x9e   : > { %s1788_s13 = sld [smem:[#allocation7 + $0x9d]]  ;;  %v512_v3 = vstv %s1769_s1  ;;  %v509_v11 = vmul.f32 %v508_v63, %v490_v50  ;;  %v502_v20 = vadd.f32 %v501_v5, %v477_v1  ;;  %v590_v5 = vld [vmem:[%s1567_s26 + $0xa] sm:$0xf] }
  0x9f   : > { %s1792_s14 = sld [smem:[#allocation7 + $0x8a]]  ;;  %v517_v7 = vstv %s1771_s0  ;;  %v513_v15 = vmul.f32 %v512_v3, %v490_v50  ;;  %v506_v23 = vadd.f32 %v505_v10, %v481_v4 }
  0xa0   : > { %s1795_s17 = sld [smem:[#allocation7 + $0x8e]]  ;;  %v521_v8 = vstv %s1776_s2  ;;  %v518_v17 = vmul.f32 %v1089_v6, %v517_v7  ;;  %v510_v24 = vadd.f32 %v509_v11, %v485_v9 }
  0xa1   : > { %s1797_s24 = sld [smem:[#allocation7 + $0x92]]  ;;  %v525_v12 = vstv %s1779_s16  ;;  %v522_v18 = vmul.f32 %v1089_v6, %v521_v8  ;;  %v514_v28 = vadd.f32 %v513_v15, %v489_v13 }
  0xa2   : > { %s1801_s3 = sld [smem:[#allocation7 + $0x96]]  ;;  %v529_v19 = vstv %s1782_s5  ;;  %v526_v21 = vmul.f32 %v1089_v6, %v525_v12  ;;  %v519_v32 = vadd.f32 %v518_v17, %v494_v14 }
  0xa3   : > { %s1804_s12 = sld [smem:[#allocation7 + $0x9a]]  ;;  %v533_v22 = vstv %s1784_s30  ;;  %v530_v29 = vmul.f32 %v1089_v6, %v529_v19  ;;  %v523_v33 = vadd.f32 %v522_v18, %v498_v16 }
  0xa4   : > { %s1808_s23 = sld [smem:[#allocation7 + $0x9e]]  ;;  %v537_v25 = vstv %s1788_s13  ;;  %v534_v34 = vmul.f32 %v1089_v6, %v533_v22  ;;  %v527_v36 = vadd.f32 %v526_v21, %v502_v20  ;;  %v1118_v22 = vld [vmem:[%s1567_s26 + $0x1a] sm:$0xf] }
  0xa5   : > { %s1810_s15 = sld [smem:[#allocation7 + $0x8b]]  ;;  %v542_v27 = vstv %s1792_s14  ;;  %v538_v37 = vmul.f32 %v1089_v6, %v537_v25  ;;  %v531_v45 = vadd.f32 %v530_v29, %v506_v23 }
  0xa6   : > { %s1814_s6 = sld [smem:[#allocation7 + $0x8f]]  ;;  %v546_v30 = vstv %s1795_s17  ;;  %v543_v38 = vmul.f32 %v1096_v26, %v542_v27  ;;  %v535_v48 = vadd.f32 %v534_v34, %v510_v24 }
  0xa7   : > { %s1817_s4 = sld [smem:[#allocation7 + $0x93]]  ;;  %v550_v31 = vstv %s1797_s24  ;;  %v547_v40 = vmul.f32 %v1096_v26, %v546_v30  ;;  %v539_v52 = vadd.f32 %v538_v37, %v514_v28 }
  0xa8   : > { %s1820_s7 = sld [smem:[#allocation7 + $0x97]]  ;;  %v554_v35 = vstv %s1801_s3  ;;  %v551_v41 = vmul.f32 %v1096_v26, %v550_v31  ;;  %v544_v53 = vadd.f32 %v543_v38, %v519_v32 }
  0xa9   : > { %s1825_s28 = sld [smem:[#allocation7 + $0x9b]]  ;;  %v558_v39 = vstv %s1804_s12  ;;  %v555_v46 = vmul.f32 %v1096_v26, %v554_v35  ;;  %v548_v56 = vadd.f32 %v547_v40, %v523_v33 }
  0xaa   : > { %s1829_s21 = sld [smem:[#allocation7 + $0x9f]]  ;;  %v562_v42 = vstv %s1808_s23  ;;  %v559_v49 = vmul.f32 %v1096_v26, %v558_v39  ;;  %v552_v57 = vadd.f32 %v551_v41, %v527_v36 }
  0xab   : > { %s1832_s8 = sld [smem:[#allocation7 + $0xa0]]  ;;  %v567_v44 = vstv %s1810_s15  ;;  %v563_v54 = vmul.f32 %v1096_v26, %v562_v42  ;;  %v556_v59 = vadd.f32 %v555_v46, %v531_v45 }
  0xac   : > { %s1836_s27 = sld [smem:[#allocation7 + $0xa4]]  ;;  %v571_v47 = vstv %s1814_s6  ;;  %v568_v55 = vmul.f32 %v1103_v43, %v567_v44  ;;  %v560_v1 = vadd.f32 %v559_v49, %v535_v48 }
  0xad   : > { %s1840_s9 = sld [smem:[#allocation7 + $0xa8]]  ;;  %v575_v50 = vstv %s1817_s4  ;;  %v572_v58 = vmul.f32 %v1103_v43, %v571_v47  ;;  %v564_v2 = vadd.f32 %v563_v54, %v539_v52 }
  0xae   : > { %s1845_s10 = sld [smem:[#allocation7 + $0xac]]  ;;  %v579_v51 = vstv %s1820_s7  ;;  %v576_v60 = vmul.f32 %v1103_v43, %v575_v50  ;;  %v569_v3 = vadd.f32 %v568_v55, %v544_v53  ;;  %v1127_v53 = vld [vmem:[%s1567_s26 + $0x2a] sm:$0xf] }
  0xaf   : > { %s1848_s29 = sld [smem:[#allocation7 + $0xb0]]  ;;  %v580_v61 = vmul.f32 %v1103_v43, %v579_v51  ;;  %v583_v62 = vstv %s1825_s28  ;;  %v573_v7 = vadd.f32 %v572_v58, %v548_v56 }
  0xb0   : > { %s1850_s22 = sld [smem:[#allocation7 + $0xb4]]  ;;  %v587_v4 = vstv %s1829_s21  ;;  %v584_v8 = vmul.f32 %v1103_v43, %v583_v62  ;;  %v577_v11 = vadd.f32 %v576_v60, %v552_v57 }
  0xb1   : > { %s1853_s25 = sld [smem:[#allocation7 + $0xb8]]  ;;  %v592_v6 = vstv %s1832_s8  ;;  %v581_v12 = vadd.f32 %v580_v61, %v556_v59  ;;  %v588_v15 = vmul.f32 %v1103_v43, %v587_v4 }
  0xb2   : > { %s1856_s19 = sld [smem:[#allocation7 + $0xbc]]  ;;  %v596_v9 = vstv %s1836_s27  ;;  %v593_v16 = vmul.f32 %v592_v6, %v590_v5  ;;  %v585_v24 = vadd.f32 %v584_v8, %v560_v1 }
  0xb3   : > { %s1861_s11 = sld [smem:[#allocation7 + $0xa1]]  ;;  %v600_v10 = vstv %s1840_s9  ;;  %v597_v19 = vmul.f32 %v596_v9, %v590_v5  ;;  %v589_v32 = vadd.f32 %v588_v15, %v564_v2  ;;  %v1136_v9 = vld [vmem:[%s1567_s26 + $0x3a] sm:$0xf] }
  0xb4   : > { %s1865_s20 = sld [smem:[#allocation7 + $0xa5]]  ;;  %v604_v13 = vstv %s1845_s10  ;;  %v601_v20 = vmul.f32 %v600_v10, %v590_v5 }
  0xb5   : > { %s1868_s18 = sld [smem:[#allocation7 + $0xa9]]  ;;  %v608_v14 = vstv %s1848_s29  ;;  %v605_v25 = vmul.f32 %v604_v13, %v590_v5 }
  0xb6   : > { %s1871_s1 = sld [smem:[#allocation7 + $0xad]]  ;;  %v612_v17 = vstv %s1850_s22  ;;  %v609_v26 = vmul.f32 %v608_v14, %v590_v5  ;;  %v602_v37 = vadd.f32 %v601_v20, %v569_v3 }
  0xb7   : > { %s1876_s0 = sld [smem:[#allocation7 + $0xb1]]  ;;  %v616_v18 = vstv %s1853_s25  ;;  %v613_v28 = vmul.f32 %v612_v17, %v590_v5  ;;  %v606_v39 = vadd.f32 %v605_v25, %v573_v7 }
  0xb8   : > { %s1879_s2 = sld [smem:[#allocation7 + $0xb5]]  ;;  %v620_v21 = vstv %s1856_s19  ;;  %v617_v29 = vmul.f32 %v616_v18, %v590_v5  ;;  %v610_v43 = vadd.f32 %v609_v26, %v577_v11 }
  0xb9   : > { %s2169_s16 = sld [smem:[#allocation25_spill]]  ;;  %v625_v23 = vstv %s1861_s11  ;;  %v621_v34 = vmul.f32 %v620_v21, %v590_v5  ;;  %v614_v44 = vadd.f32 %v613_v28, %v581_v12 }
  0xba   : > { %s1883_s5 = sld [smem:[#allocation7 + $0xb9]]  ;;  %v629_v27 = vstv %s1865_s20  ;;  %v626_v35 = vmul.f32 %v1118_v22, %v625_v23  ;;  %v618_v45 = vadd.f32 %v617_v29, %v585_v24 }
  0xbb   : > { %s2170_s30 = sld [smem:[#allocation26_spill]]  ;;  %v633_v30 = vstv %s1868_s18  ;;  %v630_v38 = vmul.f32 %v1118_v22, %v629_v27  ;;  %v622_v46 = vadd.f32 %v621_v34, %v589_v32 }
  0xbc   : > { %s1885_s13 = sld [smem:[#allocation7 + $0xbd]]  ;;  %v637_v31 = vstv %s1871_s1  ;;  %v634_v40 = vmul.f32 %v1118_v22, %v633_v30 }
  0xbd   : > { %s1887_s14 = sld [smem:[#allocation7 + $0xa2]]  ;;  %v638_v41 = vmul.f32 %v1118_v22, %v637_v31  ;;  %v641_v42 = vstv %s1876_s0 }
  0xbe   : > { %s1890_s17 = sld [smem:[#allocation7 + $0xa6]]  ;;  %v645_v48 = vstv %s1879_s2  ;;  %v642_v51 = vmul.f32 %v1118_v22, %v641_v42  ;;  %v635_v55 = vadd.f32 %v634_v40, %v602_v37 }
  0xbf   : > { %v232_v63 = vstv %s2169_s16  ;;  %s1894_s24 = sld [smem:[#allocation7 + $0xaa]]  ;;  %v639_v56 = vadd.f32 %v638_v41, %v606_v39  ;;  %v646_v59 = vmul.f32 %v1118_v22, %v645_v48 }
  0xc0   : > { %s1899_s3 = sld [smem:[#allocation7 + $0xae]]  ;;  %v594_v33 = vadd.f32 %v593_v16, %v232_v63  ;;  %v649_v49 = vstv %s1883_s5  ;;  %v643_v3 = vadd.f32 %v642_v51, %v610_v43 }
  0xc1   : > { %v234_v0 = vstv %s2170_s30  ;;  %s1903_s12 = sld [smem:[#allocation7 + $0xb2]]  ;;  %v650_v60 = vmul.f32 %v1118_v22, %v649_v49  ;;  %v647_v12 = vadd.f32 %v646_v59, %v614_v44 }
  0xc2   : > { %s1907_s23 = sld [smem:[#allocation7 + $0xb6]]  ;;  %v598_v36 = vadd.f32 %v597_v19, %v234_v0  ;;  %v627_v47 = vadd.f32 %v626_v35, %v594_v33  ;;  %v653_v52 = vstv %s1885_s13 }
  0xc3   : > { %s1911_s15 = sld [smem:[#allocation7 + $0xba]]  ;;  %v658_v54 = vstv %s1887_s14  ;;  %v654_v63 = vmul.f32 %v1118_v22, %v653_v52  ;;  %v651_v13 = vadd.f32 %v650_v60, %v618_v45 }
  0xc4   : > { %s1916_s6 = sld [smem:[#allocation7 + $0xbe]]  ;;  %v631_v50 = vadd.f32 %v630_v38, %v598_v36  ;;  %v662_v57 = vstv %s1890_s17  ;;  %v659_v0 = vmul.f32 %v1127_v53, %v658_v54  ;;  %v722_v38 = vld [vmem:[%s1567_s26 + $0xc] sm:$0xf] }
  0xc5   : > { %s1919_s4 = sld [smem:[#allocation7 + $0xa3]]  ;;  %v666_v58 = vstv %s1894_s24  ;;  %v663_v4 = vmul.f32 %v1127_v53, %v662_v57  ;;  %v655_v16 = vadd.f32 %v654_v63, %v622_v46 }
  0xc6   : > { %s1923_s7 = sld [smem:[#allocation7 + $0xa7]]  ;;  %v670_v61 = vstv %s1899_s3  ;;  %v667_v5 = vmul.f32 %v1127_v53, %v666_v58  ;;  %v660_v17 = vadd.f32 %v659_v0, %v627_v47 }
  0xc7   : > { %s1925_s28 = sld [smem:[#allocation7 + $0xab]]  ;;  %v674_v62 = vstv %s1903_s12  ;;  %v671_v7 = vmul.f32 %v1127_v53, %v670_v61  ;;  %v664_v20 = vadd.f32 %v663_v4, %v631_v50 }
  0xc8   : > { %s1927_s21 = sld [smem:[#allocation7 + $0xaf]]  ;;  %v678_v1 = vstv %s1907_s23  ;;  %v675_v8 = vmul.f32 %v1127_v53, %v674_v62  ;;  %v668_v24 = vadd.f32 %v667_v5, %v635_v55 }
  0xc9   : > { %s1930_s8 = sld [smem:[#allocation7 + $0xb3]]  ;;  %v682_v2 = vstv %s1911_s15  ;;  %v679_v14 = vmul.f32 %v1127_v53, %v678_v1  ;;  %v672_v25 = vadd.f32 %v671_v7, %v639_v56  ;;  %v1153_v1 = vld [vmem:[%s1567_s26 + $0x1c] sm:$0xf] }
  0xca   : > { %s1932_s27 = sld [smem:[#allocation7 + $0xb7]]  ;;  %v686_v6 = vstv %s1916_s6  ;;  %v683_v15 = vmul.f32 %v1127_v53, %v682_v2  ;;  %v676_v26 = vadd.f32 %v675_v8, %v643_v3 }
  0xcb   : > { %s1936_s9 = sld [smem:[#allocation7 + $0xbb]]  ;;  %v691_v10 = vstv %s1919_s4  ;;  %v687_v18 = vmul.f32 %v1127_v53, %v686_v6  ;;  %v680_v27 = vadd.f32 %v679_v14, %v647_v12 }
  0xcc   : > { %s1941_s10 = sld [smem:[#allocation7 + $0xbf]]  ;;  %v695_v11 = vstv %s1923_s7  ;;  %v692_v21 = vmul.f32 %v1136_v9, %v691_v10  ;;  %v684_v28 = vadd.f32 %v683_v15, %v651_v13 }
  0xcd   : > { %s1945_s29 = sld [smem:[#allocation7 + $0xc0]]  ;;  %v699_v19 = vstv %s1925_s28  ;;  %v696_v22 = vmul.f32 %v1136_v9, %v695_v11  ;;  %v688_v31 = vadd.f32 %v687_v18, %v655_v16  ;;  %v1162_v18 = vld [vmem:[%s1567_s26 + $0x2c] sm:$0xf] }
  0xce   : > { %s1949_s22 = sld [smem:[#allocation7 + $0xc4]]  ;;  %v703_v23 = vstv %s1927_s21  ;;  %v700_v29 = vmul.f32 %v1136_v9, %v699_v19  ;;  %v693_v35 = vadd.f32 %v692_v21, %v660_v17 }
  0xcf   : > { %s1953_s25 = sld [smem:[#allocation7 + $0xc8]]  ;;  %v707_v30 = vstv %s1930_s8  ;;  %v704_v32 = vmul.f32 %v1136_v9, %v703_v23  ;;  %v697_v36 = vadd.f32 %v696_v22, %v664_v20 }
  0xd0   : > { %s1956_s19 = sld [smem:[#allocation7 + $0xcc]]  ;;  %v711_v33 = vstv %s1932_s27  ;;  %v708_v40 = vmul.f32 %v1136_v9, %v707_v30  ;;  %v701_v44 = vadd.f32 %v700_v29, %v668_v24 }
  0xd1   : > { %s1961_s11 = sld [smem:[#allocation7 + $0xd0]]  ;;  %v715_v34 = vstv %s1936_s9  ;;  %v712_v45 = vmul.f32 %v1136_v9, %v711_v33  ;;  %v705_v48 = vadd.f32 %v704_v32, %v672_v25 }
  0xd2   : > { %s1963_s20 = sld [smem:[#allocation7 + $0xd4]]  ;;  %v719_v37 = vstv %s1941_s10  ;;  %v716_v46 = vmul.f32 %v1136_v9, %v715_v34  ;;  %v709_v56 = vadd.f32 %v708_v40, %v676_v26 }
  0xd3   : > { %s1966_s18 = sld [smem:[#allocation7 + $0xd8]]  ;;  %v724_v39 = vstv %s1945_s29  ;;  %v720_v49 = vmul.f32 %v1136_v9, %v719_v37  ;;  %v713_v58 = vadd.f32 %v712_v45, %v680_v27 }
  0xd4   : > { %s1969_s1 = sld [smem:[#allocation7 + $0xdc]]  ;;  %v728_v41 = vstv %s1949_s22  ;;  %v725_v50 = vmul.f32 %v724_v39, %v722_v38  ;;  %v717_v59 = vadd.f32 %v716_v46, %v684_v28 }
  0xd5   : > { %s1971_s0 = sld [smem:[#allocation7 + $0xc1]]  ;;  %v732_v42 = vstv %s1953_s25  ;;  %v729_v52 = vmul.f32 %v728_v41, %v722_v38  ;;  %v721_v62 = vadd.f32 %v720_v49, %v688_v31 }
  0xd6   : > { %s1974_s2 = sld [smem:[#allocation7 + $0xc5]]  ;;  %v736_v43 = vstv %s1956_s19  ;;  %v733_v53 = vmul.f32 %v732_v42, %v722_v38  ;;  %v726_v63 = vadd.f32 %v725_v50, %v693_v35 }
  0xd7   : > { %s1978_s16 = sld [smem:[#allocation7 + $0xc9]]  ;;  %v740_v47 = vstv %s1961_s11  ;;  %v737_v54 = vmul.f32 %v736_v43, %v722_v38  ;;  %v730_v3 = vadd.f32 %v729_v52, %v697_v36 }
  0xd8   : > { %s1983_s5 = sld [smem:[#allocation7 + $0xcd]]  ;;  %v744_v51 = vstv %s1963_s20  ;;  %v741_v57 = vmul.f32 %v740_v47, %v722_v38  ;;  %v734_v4 = vadd.f32 %v733_v53, %v701_v44  ;;  %v1171_v44 = vld [vmem:[%s1567_s26 + $0x3c] sm:$0xf] }
  0xd9   : > { %s1988_s30 = sld [smem:[#allocation7 + $0xd1]]  ;;  %v748_v55 = vstv %s1966_s18  ;;  %v745_v60 = vmul.f32 %v744_v51, %v722_v38  ;;  %v738_v5 = vadd.f32 %v737_v54, %v705_v48 }
  0xda   : > { %s1991_s13 = sld [smem:[#allocation7 + $0xd5]]  ;;  %v752_v61 = vstv %s1969_s1  ;;  %v749_v0 = vmul.f32 %v748_v55, %v722_v38  ;;  %v742_v7 = vadd.f32 %v741_v57, %v709_v56 }
  0xdb   : > { %s1994_s14 = sld [smem:[#allocation7 + $0xd9]]  ;;  %v757_v2 = vstv %s1971_s0  ;;  %v753_v8 = vmul.f32 %v752_v61, %v722_v38  ;;  %v746_v11 = vadd.f32 %v745_v60, %v713_v58 }
  0xdc   : > { %s1997_s17 = sld [smem:[#allocation7 + $0xdd]]  ;;  %v761_v6 = vstv %s1974_s2  ;;  %v758_v12 = vmul.f32 %v1153_v1, %v757_v2  ;;  %v750_v15 = vadd.f32 %v749_v0, %v717_v59 }
  0xdd   : > { %s1999_s24 = sld [smem:[#allocation7 + $0xc2]]  ;;  %v765_v9 = vstv %s1978_s16  ;;  %v762_v16 = vmul.f32 %v1153_v1, %v761_v6  ;;  %v754_v24 = vadd.f32 %v753_v8, %v721_v62 }
  0xde   : > { %s2002_s3 = sld [smem:[#allocation7 + $0xc6]]  ;;  %v769_v10 = vstv %s1983_s5  ;;  %v766_v20 = vmul.f32 %v1153_v1, %v765_v9  ;;  %v759_v28 = vadd.f32 %v758_v12, %v726_v63 }
  0xdf   : > { %s2006_s12 = sld [smem:[#allocation7 + $0xca]]  ;;  %v773_v13 = vstv %s1988_s30  ;;  %v770_v21 = vmul.f32 %v1153_v1, %v769_v10  ;;  %v763_v32 = vadd.f32 %v762_v16, %v730_v3 }
  0xe0   : > { %s2009_s23 = sld [smem:[#allocation7 + $0xce]]  ;;  %v777_v14 = vstv %s1991_s13  ;;  %v774_v25 = vmul.f32 %v1153_v1, %v773_v13  ;;  %v767_v36 = vadd.f32 %v766_v20, %v734_v4 }
  0xe1   : > { %s2013_s15 = sld [smem:[#allocation7 + $0xd2]]  ;;  %v781_v17 = vstv %s1994_s14  ;;  %v778_v26 = vmul.f32 %v1153_v1, %v777_v14  ;;  %v771_v37 = vadd.f32 %v770_v21, %v738_v5 }
  0xe2   : > { %s2017_s6 = sld [smem:[#allocation7 + $0xd6]]  ;;  %v785_v22 = vstv %s1997_s17  ;;  %v782_v29 = vmul.f32 %v1153_v1, %v781_v17  ;;  %v775_v40 = vadd.f32 %v774_v25, %v742_v7  ;;  %s1430_s17 = smov [#allocation9]  }
  0xe3   : > { %v790_v19 = vstv %s1999_s24  ;;  %s2022_s4 = sld [smem:[#allocation7 + $0xda]]  ;;  %v786_v33 = vmul.f32 %v1153_v1, %v785_v22  ;;  %v779_v41 = vadd.f32 %v778_v26, %v746_v11  ;;  %s1339_s24 = sshll.u32 %s1430_s17, 4  ;;  %s1340_s24 = int_to_ptr.vmem [resolvable:$false] %s1339_s24 }
  0xe4   : > { %v794_v23 = vstv %s2002_s3  ;;  %s2026_s7 = sld [smem:[#allocation7 + $0xde]]  ;;  %v791_v30 = vmul.f32 %v1162_v18, %v790_v19  ;;  %v783_v45 = vadd.f32 %v782_v29, %v750_v15  ;;  %s1341_s3 = scalar_lea.vmem %s1340_s24, 1024 }
  0xe5   : > { %v798_v27 = vstv %s2006_s12  ;;  %s2029_s28 = sld [smem:[#allocation7 + $0xc3]]  ;;  %v795_v34 = vmul.f32 %v1162_v18, %v794_v23  ;;  %v787_v49 = vadd.f32 %v786_v33, %v754_v24 }
  0xe6   : > { %v802_v31 = vstv %s2009_s23  ;;  %s2032_s21 = sld [smem:[#allocation7 + $0xc7]]  ;;  %v799_v38 = vmul.f32 %v1162_v18, %v798_v27  ;;  %v792_v46 = vadd.f32 %v791_v30, %v759_v28 }
  0xe7   : > { %s2171_s8 = sld [smem:[#allocation24_spill]]  ;;  %v806_v35 = vstv %s2013_s15  ;;  %v803_v42 = vmul.f32 %v1162_v18, %v802_v31  ;;  %v796_v50 = vadd.f32 %v795_v34, %v763_v32 }
  0xe8   : > { %s2035_s27 = sld [smem:[#allocation7 + $0xcb]]  ;;  %v810_v39 = vstv %s2017_s6  ;;  %v807_v47 = vmul.f32 %v1162_v18, %v806_v35  ;;  %v800_v53 = vadd.f32 %v799_v38, %v767_v36 }
  0xe9   : > { %s2038_s9 = sld [smem:[#allocation7 + $0xcf]]  ;;  %v814_v43 = vstv %s2022_s4  ;;  %v811_v51 = vmul.f32 %v1162_v18, %v810_v39  ;;  %v804_v57 = vadd.f32 %v803_v42, %v771_v37 }
  0xea   : > { %s2042_s10 = sld [smem:[#allocation7 + $0xd3]]  ;;  %v818_v48 = vstv %s2026_s7  ;;  %v815_v54 = vmul.f32 %v1162_v18, %v814_v43  ;;  %v808_v61 = vadd.f32 %v807_v47, %v775_v40 }
  0xeb   : > { %s2046_s22 = sld [smem:[#allocation7 + $0xd7]]  ;;  %v823_v52 = vstv %s2029_s28  ;;  %v819_v58 = vmul.f32 %v1162_v18, %v818_v48  ;;  %v812_v1 = vadd.f32 %v811_v51, %v779_v41 }
  0xec   : > { %s2049_s25 = sld [smem:[#allocation7 + $0xdb]]  ;;  %v824_v55 = vmul.f32 %v1171_v44, %v823_v52  ;;  %v827_v56 = vstv %s2032_s21  ;;  %v816_v5 = vadd.f32 %v815_v54, %v783_v45 }
  0xed   : > { %s1007_s29 = sshll.u32 %s2171_s8, 5  ;;  %s2052_s26 = sld [smem:[#allocation7 + $0xdf]]  ;;  %v828_v59 = vmul.f32 %v1171_v44, %v827_v56  ;;  %v820_v9 = vadd.f32 %v819_v58, %v787_v49 }
  0xee   : > { %v831_v60 = vstv %s2035_s27  ;;  %v825_v62 = vadd.f32 %v824_v55, %v792_v46  ;;  %s2172_s19 = sld [smem:[#allocation17_spill]]  ;;  %s230_s11 = scalar_lea.vmem [#allocation9], %s1007_s29 }
  0xef   : > { %v832_v63 = vmul.f32 %v1171_v44, %v831_v60  ;;  %v835_v0 = vstv %s2038_s9  ;;  %v829_v2 = vadd.f32 %v828_v59, %v796_v50  ;;  %s885_s18 = sshll.u32 %s230_s11, 4  ;;  %s2173_s1 = sld [smem:[#allocation20_spill]]  ;;  %s2073_s18 = int_to_ptr.vmem [resolvable:$true] %s885_s18 }
  0xf0   : > { %v836_v3 = vmul.f32 %v1171_v44, %v835_v0  ;;  %v839_v4 = vstv %s2042_s10  ;;  %855 = vst.msk [vmem:[%s230_s11] sm:$0xf] %vm854_vm0, %v825_v62  ;;  %s2174_s16 = sld [smem:[#allocation30_spill]]  ;;  %s871_s13 = scalar_lea.sflag [#allocation4], %s2171_s8 }
  0xf1   : > { %v833_v6 = vadd.f32 %v832_v63, %v800_v53  ;;  %v840_v7 = vmul.f32 %v1171_v44, %v839_v4  ;;  %v843_v8 = vstv %s2046_s22  ;;  %1180 = vst.msk [vmem:[%s230_s11 + $0x4] sm:$0xf] %vm854_vm0, %v829_v2  ;;  %s1335_s14 = scalar_lea.vmem %s2073_s18, 512  ;;  %p1342_p0 = scmp.lt.s32.totalorder %s2073_s18, %s1340_s24 }
  0xf2   : > { %v837_v10 = vadd.f32 %v836_v3, %v804_v57  ;;  %v844_v11 = vmul.f32 %v1171_v44, %v843_v8  ;;  %v847_v12 = vstv %s2049_s25  ;;  %p1336_p3 = scmp.ne.s32.totalorder %s2073_s18, %s1335_s14  ;;  %p1343_p9 = scmp.lt.s32.totalorder %s1341_s3, %s1335_s14 }
  0xf3   : > { %v841_v13 = vadd.f32 %v840_v7, %v808_v61  ;;  %v848_v14 = vmul.f32 %v1171_v44, %v847_v12  ;;  %v851_v15 = vstv %s2052_s26  ;;  %1181 = vst.msk [vmem:[%s230_s11 + $0x8] sm:$0xf] %vm854_vm0, %v833_v6 }
  0xf4   : > { %s1193_s20 = sshll.u32 %s2172_s19, 9  ;;  %v845_v16 = vadd.f32 %v844_v11, %v812_v1  ;;  %v852_v17 = vmul.f32 %v1171_v44, %v851_v15  ;;  %1182 = vst.msk [vmem:[%s230_s11 + $0xc] sm:$0xf] %vm854_vm0, %v837_v10  ;;  %p1344_p12 = por %p1343_p9, %p1342_p0 }
  0xf5   : > { %v849_v18 = vadd.f32 %v848_v14, %v816_v5  ;;  %1183 = vst.msk [vmem:[%s230_s11 + $0x10] sm:$0xf] %vm854_vm0, %v841_v13  ;;  %p2176_p7 = scmp.ne.s32.totalorder %s2173_s1, 0 }
  0xf6   : > { %s2175_s5 = smov %s2174_s16  ;;  %s2071_s30 = scalar_lea.hbm %s2174_s16, %s1193_s20  ;;  %v853_v19 = vadd.f32 %v852_v17, %v820_v9  ;;  %1184 = vst.msk [vmem:[%s230_s11 + $0x14] sm:$0xf] %vm854_vm0, %v845_v16 }
  0xf7   : > { %1185 = vst.msk [vmem:[%s230_s11 + $0x18] sm:$0xf] %vm854_vm0, %v849_v18  ;;  %p1337_p13 = pnand %p1336_p3, %p2176_p7 }
  0xf8   : > { %1186 = vst.msk [vmem:[%s230_s11 + $0x1c] sm:$0xf] %vm854_vm0, %v853_v19 }
  0xf9   : > { %p1338_p4 = pneg %p1337_p13 }
  0xfb   : > { %p1345_p2 = pnand %p1344_p12, %p1338_p4 }
  0xfd   : > { %1348 = shalt.err (!%p1345_p2)
}
  0xfe   : > { %s1349_s12 = scalar_lea.hbm %s2071_s30, 512  ;;  %s1353_s6 = scalar_lea.hbm %s2175_s5, 1024 }
  0xff   : > { %p1350_p8 = scmp.ne.s32.totalorder %s2071_s30, %s1349_s12  ;;  %p1354_p10 = scmp.lt.s32.totalorder %s2071_s30, %s2175_s5 }
 0x100   : > { %p1355_p11 = scmp.lt.s32.totalorder %s1353_s6, %s1349_s12 }
 0x101   : > { %p1351_p5 = pnand %p1350_p8, %p2176_p7 }
 0x102   : > { %p1356_p1 = por %p1355_p11, %p1354_p10 }
 0x103   : > { %p1352_p6 = pneg %p1351_p5 }
 0x105   : > { %p1357_p3 = pnand %p1356_p1, %p1352_p6 }
 0x107   : > { %1360 = shalt.err (!%p1357_p3)
}
 0x108   : > { %s1431_s28 = smov 64   ;;  %s1432_s21 = smov 4  }
 0x109   : > { %1204 = dma.vmem_to_hbm [thread:$0]  (%p2176_p7), %s2073_s18, 512, %s2071_s30, %s871_s13, %s1431_s28, %s1431_s28, %s1432_s21  }
 0x10a PF: > { %s2177_s27 = sld [smem:[#allocation14_spill]] }
 0x10b   : > { %s2178_s9 = sld [smem:[#allocation21_spill]] }
 0x10c   : > { %s2179_s10 = sld [smem:[#allocation19_spill]] }
 0x110   : > { %s900_s29 = sand.u32 1, %s2177_s27  }
 0x111   : > { %p2180_p13 = scmp.ne.s32.totalorder %s2178_s9, 0  ;;  %s901_s22 = scalar_lea.sflag [#allocation4], %s900_s29 }
 0x112   : > { %p2181_p4 = scmp.ge.s32.totalorder %s2179_s10, 2 }
 0x114   : > { %p1218_p0 = pnand %p2181_p4, %p2180_p13 }
 0x116   : > { %p1219_p9 = pneg %p1218_p0 }
 0x118   : > { %1398 = dma.done.wait (%p1219_p9), %s901_s22, 512  }
 0x119   : > { %1400 = vsyncadd (%p1219_p9), %s901_s22, 4294966784  ;;  %s21_s17 = sadd.s32 1, %s2179_s10   ;;  %s2182_s12 = sld [smem:[#allocation15_spill]] }
 0x11a   : > { %p18_p12 = scmp.ge.s32.totalorder %s21_s17, 4   ;;  %s2183_s13 = sld [smem:[#allocation16_spill]] }
 0x11b   : > { %s2184_s14 = sld [smem:[#allocation23_spill]] }
 0x11c   : > { %s2185_s15 = sld [smem:[#allocation18_spill]]  ;;  %20 = sbr.rel (!%p18_p12) target bundleno = 13 (0xd), region = 97 }
 0x11d   : > { %s2186_s16 = sld [smem:[#allocation22_spill]] }
 0x121   :  { %906 = vsyncpa [#allocation3], 1 }
 0x122   :  { %908 = vsyncpa [#allocation3 + $0x1], 1 }
 0x123   :  { %909 = vsyncpa [#allocation4], 1 }
 0x124   :  { %911 = vsyncpa [#allocation4 + $0x1], 1 }
 0x125   :  { %912 = vsyncpa [#allocation5], 1 }
 0x126   :  { %914 = vsyncpa [#allocation5 + $0x1], 1 }
 0x127   :  { %915 = vsyncpa [#allocation6], 1 }
 0x128   :  { %917 = vsyncpa [#allocation6 + $0x1], 1 }

</bundles_post_ra>
